<compile_context>
chip_gen: v5e
topology: v5e:2x2
jax: 0.10.0
libtpu: 0.0.40
codegen_flags: <defaults>
</compile_context>

<pallas_src>
import jax
import jax.numpy as jnp
from jax.experimental import pallas as pl
from jax.experimental.pallas import tpu as pltpu

# ---- hyperparameters implied by the module -------------------------------------------------
IN_CHANNELS = 8
HIDDEN_CHANNELS = 32
OUT_CHANNELS = 4
N_LAYERS = 1            # Network(..., n_layers=1)
N_FILTERS = 2           # SAN default number of filters J
N_CONVS = 2             # up + down attention convolutions inside one SANLayer
ORDER_HARMONIC = 5      # SAN default
EPSILON_HARMONIC = 0.1  # SAN default

# ---- packed parameter buffer layout (single contiguous f32 buffer) --------------------------
OUT_PAD = 128                                              # lane-dense padded output channels
PROJ_COLS = (N_CONVS * N_FILTERS + 1) * HIDDEN_CHANNELS    # 160: [W_up0|W_up1|W_dn0|W_dn1|W_h]
ATT_ROW0 = IN_CHANNELS                                     # 8 attention vectors, one per row
WLIN_ROW0 = ATT_ROW0 + 2 * N_CONVS * N_FILTERS             # 16
BLIN_ROW = WLIN_ROW0 + HIDDEN_CHANNELS                     # 48
PARAM_ROWS = BLIN_ROW + 1                                  # 49
PARAM_LANES = max(PROJ_COLS, OUT_PAD)                      # 160


# ---- single fused kernel: whole forward pass for a block of TB complexes --------------------
def _fused_forward_kernel(x_ref, lup_ref, ldn_ref, p_ref, o_ref):
    TB, N, FIN = x_ref.shape
    H = HIDDEN_CHANNELS

    # packed parameters (one DMA'd buffer; static sub-views)
    w_proj = p_ref[0:FIN, 0:PROJ_COLS]                       # (Fin, 5H) fused projections
    att = p_ref[ATT_ROW0:ATT_ROW0 + 2 * N_CONVS * N_FILTERS, 0:H]  # (8, H) attention vectors
    w_lin = p_ref[WLIN_ROW0:WLIN_ROW0 + H, 0:OUT_PAD]        # (H, OUT_PAD) zero-padded
    b_lin = p_ref[BLIN_ROW:BLIN_ROW + 1, 0:OUT_PAD]          # (1, OUT_PAD) zero-padded

    # one fused projection matmul for ALL convs and ALL complexes of the block
    x_flat = x_ref[...].reshape(TB * N, FIN)                                  # (TB*N, Fin)
    xp_all = jnp.dot(x_flat, w_proj, preferred_element_type=jnp.float32)      # (TB*N, 5H)

    h_blocks = []
    for b in range(TB):                                       # static unroll over the block
        lup = lup_ref[b]                                      # (N, N)
        ldn = ldn_ref[b]                                      # (N, N)
        r0 = b * N

        z = None
        for c, lap in enumerate((lup, ldn)):                  # up conv, down conv
            # sparsity pattern of the Laplacian (mask hoisted out of the filter loop)
            mask = lap != 0.0
            for p in range(N_FILTERS):                        # static unroll (J = 2)
                k = N_FILTERS * c + p
                xp = xp_all[r0:r0 + N, k * H:(k + 1) * H]     # (N, H)
                a_src = att[2 * k:2 * k + 1, :]               # (1, H)
                a_dst = att[2 * k + 1:2 * k + 2, :]           # (1, H)
                # destination score as a column (VPU lane-reduce), source score directly as a
                # row via dot_general (no (N,1)->(1,N) transpose / lane-crossing reshape)
                s_dst = jnp.sum(xp * a_dst, axis=-1, keepdims=True)           # (N, 1)
                s_src = jax.lax.dot_general(a_src, xp, (((1,), (1,)), ((), ())),
                                            preferred_element_type=jnp.float32)  # (1, N)
                pre = s_dst + s_src                                           # (N, N)
                logits = jnp.where(pre > 0.0, pre, jnp.exp(pre) - 1.0)        # ELU
                masked = jnp.where(mask, logits, -1e30)                       # scalar fill
                m = jnp.max(masked, axis=-1, keepdims=True)
                pexp = jnp.where(mask, jnp.exp(masked - m), 0.0)              # scalar fill
                denom = jnp.sum(pexp, axis=-1, keepdims=True)
                inv = pl.reciprocal(jnp.maximum(denom, 1e-20), approx=True)   # EUP slot
                # softmax normalisation folded into a row-scale of the (N,H) aggregate;
                # filter p uses the (p+1)-hop attention, applied right-to-left
                g = jnp.dot(pexp, xp, preferred_element_type=jnp.float32) * inv
                for _ in range(p):
                    g = jnp.dot(pexp, g, preferred_element_type=jnp.float32) * inv
                z = g if z is None else z + g

        # harmonic conv: (I - eps*(L_up+L_down))^order @ (x @ W_h), applied right-to-left
        # without materialising the identity or the matrix power
        lsum = lup + ldn
        y = xp_all[r0:r0 + N, N_CONVS * N_FILTERS * H:PROJ_COLS]              # (N, H) = x @ W_h
        for _ in range(ORDER_HARMONIC):
            y = y - jnp.float32(EPSILON_HARMONIC) * jnp.dot(
                lsum, y, preferred_element_type=jnp.float32)

        # SANLayer aggregation (ReLU)
        h_blocks.append(jnp.maximum(z + y, 0.0))                              # (N, H)

    h = jnp.concatenate(h_blocks, axis=0) if TB > 1 else h_blocks[0]          # (TB*N, H)

    # Network.linear (padded to 128 lanes -> unmasked lane-dense store) + sigmoid
    out = jnp.dot(h, w_lin, preferred_element_type=jnp.float32) + b_lin       # (TB*N, OUT_PAD)
    out = 1.0 / (1.0 + jnp.exp(-out))                                         # sigmoid
    o_ref[...] = out.reshape(TB, N, OUT_PAD)


# ---- wrapper: one pallas_call, grid over blocks of complexes --------------------------------
def network_forward(x, lap_up, lap_down, packed_params, *, block_batch=None):
    """x: (B, N, Fin) f32; lap_up/lap_down: (B, N, N) f32 -> (B, N, OUT_CHANNELS) f32."""
    batch, n, fin = x.shape

    if block_batch is None:
        # >=2 grid steps so both TensorCores get work on v7x, while each step still batches
        # several complexes ((TB*N, C) matmuls) to amortise per-step overhead.
        block_batch = max(1, batch // 2) if batch > 1 else 1
    num_blocks = -(-batch // block_batch)
    padded = num_blocks * block_batch
    if padded != batch:
        pad = padded - batch
        x = jnp.pad(x, ((0, pad), (0, 0), (0, 0)))
        lap_up = jnp.pad(lap_up, ((0, pad), (0, 0), (0, 0)))
        lap_down = jnp.pad(lap_down, ((0, pad), (0, 0), (0, 0)))

    out_pad = pl.pallas_call(
        _fused_forward_kernel,
        out_shape=jax.ShapeDtypeStruct((padded, n, OUT_PAD), jnp.float32),
        grid=(num_blocks,),
        in_specs=[
            pl.BlockSpec((block_batch, n, fin), lambda i: (i, 0, 0)),   # x
            pl.BlockSpec((block_batch, n, n), lambda i: (i, 0, 0)),     # laplacian_up
            pl.BlockSpec((block_batch, n, n), lambda i: (i, 0, 0)),     # laplacian_down
            pl.BlockSpec((PARAM_ROWS, PARAM_LANES), lambda i: (0, 0)),  # packed params (1 DMA)
        ],
        out_specs=pl.BlockSpec((block_batch, n, OUT_PAD), lambda i: (i, 0, 0)),
        compiler_params=pltpu.CompilerParams(
            dimension_semantics=("parallel",)),   # shards blocks across the 2 TCs on v7x
    )(x, lap_up, lap_down, packed_params)

    return out_pad[:batch, :, :OUT_CHANNELS]


network_forward = jax.jit(network_forward, static_argnames=("block_batch",))


# ---- parameters ------------------------------------------------------------------------------
def init_params(key):
    def xavier(k, shape, fan_in, fan_out):
        limit = jnp.sqrt(6.0 / (fan_in + fan_out))
        return jax.random.uniform(k, shape, jnp.float32, -limit, limit)

    ks = jax.random.split(key, 9)
    return {
        "w_up":       xavier(ks[0], (N_FILTERS, IN_CHANNELS, HIDDEN_CHANNELS), IN_CHANNELS, HIDDEN_CHANNELS),
        "a_up_src":   xavier(ks[1], (N_FILTERS, HIDDEN_CHANNELS), 2 * HIDDEN_CHANNELS, 1),
        "a_up_dst":   xavier(ks[2], (N_FILTERS, HIDDEN_CHANNELS), 2 * HIDDEN_CHANNELS, 1),
        "w_down":     xavier(ks[3], (N_FILTERS, IN_CHANNELS, HIDDEN_CHANNELS), IN_CHANNELS, HIDDEN_CHANNELS),
        "a_down_src": xavier(ks[4], (N_FILTERS, HIDDEN_CHANNELS), 2 * HIDDEN_CHANNELS, 1),
        "a_down_dst": xavier(ks[5], (N_FILTERS, HIDDEN_CHANNELS), 2 * HIDDEN_CHANNELS, 1),
        "w_h":        xavier(ks[6], (IN_CHANNELS, HIDDEN_CHANNELS), IN_CHANNELS, HIDDEN_CHANNELS),
        # torch.nn.Linear(hidden, out): y = x @ W^T + b; stored already transposed.
        "w_lin":      xavier(ks[7], (HIDDEN_CHANNELS, OUT_CHANNELS), HIDDEN_CHANNELS, OUT_CHANNELS),
        "b_lin":      jnp.zeros((OUT_CHANNELS,), jnp.float32),
    }


def pack_params(params):
    """Pack all parameters into a single contiguous (PARAM_ROWS, PARAM_LANES) f32 buffer."""
    w_proj = jnp.concatenate(
        [params["w_up"][0], params["w_up"][1],
         params["w_down"][0], params["w_down"][1],
         params["w_h"]], axis=1)                                     # (Fin, 5H)
    att = jnp.stack(
        [params["a_up_src"][0],   params["a_up_dst"][0],
         params["a_up_src"][1],   params["a_up_dst"][1],
         params["a_down_src"][0], params["a_down_dst"][0],
         params["a_down_src"][1], params["a_down_dst"][1]], axis=0)  # (8, H)

    buf = jnp.zeros((PARAM_ROWS, PARAM_LANES), jnp.float32)
    buf = buf.at[0:IN_CHANNELS, 0:PROJ_COLS].set(w_proj)
    buf = buf.at[ATT_ROW0:ATT_ROW0 + 2 * N_CONVS * N_FILTERS, 0:HIDDEN_CHANNELS].set(att)
    buf = buf.at[WLIN_ROW0:WLIN_ROW0 + HIDDEN_CHANNELS, 0:OUT_CHANNELS].set(params["w_lin"])
    buf = buf.at[BLIN_ROW, 0:OUT_CHANNELS].set(params["b_lin"])
    return buf


# ---- driver ----------------------------------------------------------------------------------
if __name__ == "__main__":
    key = jax.random.PRNGKey(0)
    k_data, k_params = jax.random.split(key)

    batch = 4
    n_nodes, n_edges, n_tri = 10, 16, 6   # features live on the 16 one-simplices (edges)

    xs, lups, ldns = [], [], []
    for i in range(batch):
        kb = jax.random.fold_in(k_data, i)
        k_feat, kb1a, kb1b, kb2a, kb2b = jax.random.split(kb, 5)
        b1 = (jnp.sign(jax.random.normal(kb1a, (n_nodes, n_edges)))
              * (jax.random.uniform(kb1b, (n_nodes, n_edges)) < 0.35)).astype(jnp.float32)
        b2 = (jnp.sign(jax.random.normal(kb2a, (n_edges, n_tri)))
              * (jax.random.uniform(kb2b, (n_edges, n_tri)) < 0.35)).astype(jnp.float32)
        # Hodge Laplacians of the (synthetic) simplicial complex, as dense matrices.
        ldns.append(b1.T @ b1)             # down Laplacian on edges
        lups.append(b2 @ b2.T)             # up Laplacian on edges
        xs.append(jax.random.normal(k_feat, (n_edges, IN_CHANNELS), jnp.float32))

    x = jnp.stack(xs)                      # (B, 16, 8)
    laplacian_up = jnp.stack(lups)         # (B, 16, 16)
    laplacian_down = jnp.stack(ldns)       # (B, 16, 16)

    params = init_params(k_params)
    packed = pack_params(params)           # (49, 160) single parameter buffer

    out = network_forward(x, laplacian_up, laplacian_down, packed)
    out = jax.block_until_ready(out)

    assert out.shape == (batch, n_edges, OUT_CHANNELS), out.shape
    assert bool(jnp.all(jnp.isfinite(out)))
    assert bool(jnp.all((out >= 0.0) & (out <= 1.0)))   # sigmoid output range
    print("KERNEL_OK")
</pallas_src>

<mosaic_0001>
module attributes {stable_mosaic.version = 11 : i64} {
  func.func @_fused_forward_kernel(%arg0: i32, %arg1: memref<2x16x8xf32, #tpu.memory_space<vmem>>, %arg2: memref<2x16x16xf32, #tpu.memory_space<vmem>>, %arg3: memref<2x16x16xf32, #tpu.memory_space<vmem>>, %arg4: memref<49x160xf32, #tpu.memory_space<vmem>>, %arg5: memref<2x16x128xf32, #tpu.memory_space<vmem>>) attributes {dimension_semantics = [#tpu.dimension_semantics<parallel>], iteration_bounds = array<i64: 2>, scalar_prefetch = 0 : i64, scratch_operands = 0 : i64, tpu.core_type = #tpu.core_type<tc>, window_params = [{transform_indices = @transform_0, window_bounds = array<i64: 2, 16, 8>}, {transform_indices = @transform_1, window_bounds = array<i64: 2, 16, 16>}, {transform_indices = @transform_2, window_bounds = array<i64: 2, 16, 16>}, {pipeline_mode = #tpu.pipeline_mode<synchronous>, transform_indices = @transform_3, window_bounds = array<i64: 49, 160>}, {transform_indices = @transform_4, window_bounds = array<i64: 2, 16, 128>}]} {
    %c0 = arith.constant 0 : index
    %c0_0 = arith.constant 0 : index
    %0 = vector.load %arg4[%c0, %c0_0] : memref<49x160xf32, #tpu.memory_space<vmem>>, vector<8x160xf32>
    %c8 = arith.constant 8 : index
    %c0_1 = arith.constant 0 : index
    %1 = vector.load %arg4[%c8, %c0_1] : memref<49x160xf32, #tpu.memory_space<vmem>>, vector<8x32xf32>
    %c16 = arith.constant 16 : index
    %c0_2 = arith.constant 0 : index
    %2 = vector.load %arg4[%c16, %c0_2] : memref<49x160xf32, #tpu.memory_space<vmem>>, vector<32x128xf32>
    %c48 = arith.constant 48 : index
    %c0_3 = arith.constant 0 : index
    %3 = vector.load %arg4[%c48, %c0_3] : memref<49x160xf32, #tpu.memory_space<vmem>>, vector<1x128xf32>
    %c0_4 = arith.constant 0 : index
    %c0_5 = arith.constant 0 : index
    %c0_6 = arith.constant 0 : index
    %4 = vector.load %arg1[%c0_4, %c0_5, %c0_6] : memref<2x16x8xf32, #tpu.memory_space<vmem>>, vector<2x16x8xf32>
    %5 = vector.shape_cast %4 : vector<2x16x8xf32> to vector<32x8xf32>
    %cst = arith.constant dense<0.000000e+00> : vector<32x160xf32>
    %6 = tpu.matmul %5, %0, %cst {dimension_numbers = #tpu.dot_dimension_numbers<[1], [0], [0], [1], [0, 0, 1, 1], [], []>} : vector<32x8xf32>, vector<8x160xf32>, vector<32x160xf32> -> vector<32x160xf32>
    %c0_7 = arith.constant 0 : index
    %c0_8 = arith.constant 0 : index
    %c0_9 = arith.constant 0 : index
    %7 = vector.load %arg2[%c0_7, %c0_8, %c0_9] : memref<2x16x16xf32, #tpu.memory_space<vmem>>, vector<1x16x16xf32>
    %8 = vector.shape_cast %7 : vector<1x16x16xf32> to vector<16x16xf32>
    %c0_10 = arith.constant 0 : index
    %c0_11 = arith.constant 0 : index
    %c0_12 = arith.constant 0 : index
    %9 = vector.load %arg3[%c0_10, %c0_11, %c0_12] : memref<2x16x16xf32, #tpu.memory_space<vmem>>, vector<1x16x16xf32>
    %10 = vector.shape_cast %9 : vector<1x16x16xf32> to vector<16x16xf32>
    %cst_13 = arith.constant 0.000000e+00 : f32
    %11 = vector.broadcast %cst_13 : f32 to vector<16x16xf32>
    %12 = arith.cmpf one, %8, %11 : vector<16x16xf32>
    %13 = vector.extract_strided_slice %6 {offsets = [0, 0], sizes = [16, 32], strides = [1, 1]} : vector<32x160xf32> to vector<16x32xf32>
    %14 = vector.extract_strided_slice %1 {offsets = [0, 0], sizes = [1, 32], strides = [1, 1]} : vector<8x32xf32> to vector<1x32xf32>
    %15 = vector.extract_strided_slice %1 {offsets = [1, 0], sizes = [1, 32], strides = [1, 1]} : vector<8x32xf32> to vector<1x32xf32>
    %16 = vector.broadcast %15 : vector<1x32xf32> to vector<16x32xf32>
    %17 = arith.mulf %13, %16 : vector<16x32xf32>
    %cst_14 = arith.constant dense<0.000000e+00> : vector<16xf32>
    %18 = vector.multi_reduction <add>, %17, %cst_14 [1] : vector<16x32xf32> to vector<16xf32>
    %19 = vector.shape_cast %18 : vector<16xf32> to vector<16x1xf32>
    %cst_15 = arith.constant dense<0.000000e+00> : vector<1x16xf32>
    %20 = tpu.matmul %14, %13, %cst_15 {dimension_numbers = #tpu.dot_dimension_numbers<[1], [1], [0], [0], [0, 0, 1, 0], [], []>} : vector<1x32xf32>, vector<16x32xf32>, vector<1x16xf32> -> vector<1x16xf32>
    %21 = vector.broadcast %19 : vector<16x1xf32> to vector<16x16xf32>
    %22 = vector.broadcast %20 : vector<1x16xf32> to vector<16x16xf32>
    %23 = arith.addf %21, %22 : vector<16x16xf32>
    %cst_16 = arith.constant 0.000000e+00 : f32
    %24 = vector.broadcast %cst_16 : f32 to vector<16x16xf32>
    %25 = arith.cmpf ogt, %23, %24 : vector<16x16xf32>
    %26 = math.exp %23 : vector<16x16xf32>
    %cst_17 = arith.constant 1.000000e+00 : f32
    %27 = vector.broadcast %cst_17 : f32 to vector<16x16xf32>
    %28 = arith.subf %26, %27 : vector<16x16xf32>
    %29 = arith.select %25, %23, %28 : vector<16x16xi1>, vector<16x16xf32>
    %cst_18 = arith.constant -1.000000e+30 : f32
    %30 = vector.broadcast %cst_18 : f32 to vector<16x16xf32>
    %31 = arith.select %12, %29, %30 : vector<16x16xi1>, vector<16x16xf32>
    %cst_19 = arith.constant dense<0xFF800000> : vector<16xf32>
    %32 = vector.multi_reduction <maximumf>, %31, %cst_19 [1] : vector<16x16xf32> to vector<16xf32>
    %33 = vector.shape_cast %32 : vector<16xf32> to vector<16x1xf32>
    %34 = vector.broadcast %33 : vector<16x1xf32> to vector<16x16xf32>
    %35 = arith.subf %31, %34 : vector<16x16xf32>
    %36 = math.exp %35 : vector<16x16xf32>
    %cst_20 = arith.constant 0.000000e+00 : f32
    %37 = vector.broadcast %cst_20 : f32 to vector<16x16xf32>
    %38 = arith.select %12, %36, %37 : vector<16x16xi1>, vector<16x16xf32>
    %cst_21 = arith.constant dense<0.000000e+00> : vector<16xf32>
    %39 = vector.multi_reduction <add>, %38, %cst_21 [1] : vector<16x16xf32> to vector<16xf32>
    %40 = vector.shape_cast %39 : vector<16xf32> to vector<16x1xf32>
    %cst_22 = arith.constant 9.99999968E-21 : f32
    %41 = vector.broadcast %cst_22 : f32 to vector<16x1xf32>
    %42 = arith.maximumf %40, %41 : vector<16x1xf32>
    %43 = tpu.reciprocal %42 {approx = true} : vector<16x1xf32> -> vector<16x1xf32>
    %cst_23 = arith.constant dense<0.000000e+00> : vector<16x32xf32>
    %44 = tpu.matmul %38, %13, %cst_23 {dimension_numbers = #tpu.dot_dimension_numbers<[1], [0], [0], [1], [0, 0, 1, 1], [], []>} : vector<16x16xf32>, vector<16x32xf32>, vector<16x32xf32> -> vector<16x32xf32>
    %45 = vector.broadcast %43 : vector<16x1xf32> to vector<16x32xf32>
    %46 = arith.mulf %44, %45 : vector<16x32xf32>
    %47 = vector.extract_strided_slice %6 {offsets = [0, 32], sizes = [16, 32], strides = [1, 1]} : vector<32x160xf32> to vector<16x32xf32>
    %48 = vector.extract_strided_slice %1 {offsets = [2, 0], sizes = [1, 32], strides = [1, 1]} : vector<8x32xf32> to vector<1x32xf32>
    %49 = vector.extract_strided_slice %1 {offsets = [3, 0], sizes = [1, 32], strides = [1, 1]} : vector<8x32xf32> to vector<1x32xf32>
    %50 = vector.broadcast %49 : vector<1x32xf32> to vector<16x32xf32>
    %51 = arith.mulf %47, %50 : vector<16x32xf32>
    %cst_24 = arith.constant dense<0.000000e+00> : vector<16xf32>
    %52 = vector.multi_reduction <add>, %51, %cst_24 [1] : vector<16x32xf32> to vector<16xf32>
    %53 = vector.shape_cast %52 : vector<16xf32> to vector<16x1xf32>
    %cst_25 = arith.constant dense<0.000000e+00> : vector<1x16xf32>
    %54 = tpu.matmul %48, %47, %cst_25 {dimension_numbers = #tpu.dot_dimension_numbers<[1], [1], [0], [0], [0, 0, 1, 0], [], []>} : vector<1x32xf32>, vector<16x32xf32>, vector<1x16xf32> -> vector<1x16xf32>
    %55 = vector.broadcast %53 : vector<16x1xf32> to vector<16x16xf32>
    %56 = vector.broadcast %54 : vector<1x16xf32> to vector<16x16xf32>
    %57 = arith.addf %55, %56 : vector<16x16xf32>
    %cst_26 = arith.constant 0.000000e+00 : f32
    %58 = vector.broadcast %cst_26 : f32 to vector<16x16xf32>
    %59 = arith.cmpf ogt, %57, %58 : vector<16x16xf32>
    %60 = math.exp %57 : vector<16x16xf32>
    %cst_27 = arith.constant 1.000000e+00 : f32
    %61 = vector.broadcast %cst_27 : f32 to vector<16x16xf32>
    %62 = arith.subf %60, %61 : vector<16x16xf32>
    %63 = arith.select %59, %57, %62 : vector<16x16xi1>, vector<16x16xf32>
    %cst_28 = arith.constant -1.000000e+30 : f32
    %64 = vector.broadcast %cst_28 : f32 to vector<16x16xf32>
    %65 = arith.select %12, %63, %64 : vector<16x16xi1>, vector<16x16xf32>
    %cst_29 = arith.constant dense<0xFF800000> : vector<16xf32>
    %66 = vector.multi_reduction <maximumf>, %65, %cst_29 [1] : vector<16x16xf32> to vector<16xf32>
    %67 = vector.shape_cast %66 : vector<16xf32> to vector<16x1xf32>
    %68 = vector.broadcast %67 : vector<16x1xf32> to vector<16x16xf32>
    %69 = arith.subf %65, %68 : vector<16x16xf32>
    %70 = math.exp %69 : vector<16x16xf32>
    %cst_30 = arith.constant 0.000000e+00 : f32
    %71 = vector.broadcast %cst_30 : f32 to vector<16x16xf32>
    %72 = arith.select %12, %70, %71 : vector<16x16xi1>, vector<16x16xf32>
    %cst_31 = arith.constant dense<0.000000e+00> : vector<16xf32>
    %73 = vector.multi_reduction <add>, %72, %cst_31 [1] : vector<16x16xf32> to vector<16xf32>
    %74 = vector.shape_cast %73 : vector<16xf32> to vector<16x1xf32>
    %cst_32 = arith.constant 9.99999968E-21 : f32
    %75 = vector.broadcast %cst_32 : f32 to vector<16x1xf32>
    %76 = arith.maximumf %74, %75 : vector<16x1xf32>
    %77 = tpu.reciprocal %76 {approx = true} : vector<16x1xf32> -> vector<16x1xf32>
    %cst_33 = arith.constant dense<0.000000e+00> : vector<16x32xf32>
    %78 = tpu.matmul %72, %47, %cst_33 {dimension_numbers = #tpu.dot_dimension_numbers<[1], [0], [0], [1], [0, 0, 1, 1], [], []>} : vector<16x16xf32>, vector<16x32xf32>, vector<16x32xf32> -> vector<16x32xf32>
    %79 = vector.broadcast %77 : vector<16x1xf32> to vector<16x32xf32>
    %80 = arith.mulf %78, %79 : vector<16x32xf32>
    %cst_34 = arith.constant dense<0.000000e+00> : vector<16x32xf32>
    %81 = tpu.matmul %72, %80, %cst_34 {dimension_numbers = #tpu.dot_dimension_numbers<[1], [0], [0], [1], [0, 0, 1, 1], [], []>} : vector<16x16xf32>, vector<16x32xf32>, vector<16x32xf32> -> vector<16x32xf32>
    %82 = vector.broadcast %77 : vector<16x1xf32> to vector<16x32xf32>
    %83 = arith.mulf %81, %82 : vector<16x32xf32>
    %84 = arith.addf %46, %83 : vector<16x32xf32>
    %cst_35 = arith.constant 0.000000e+00 : f32
    %85 = vector.broadcast %cst_35 : f32 to vector<16x16xf32>
    %86 = arith.cmpf one, %10, %85 : vector<16x16xf32>
    %87 = vector.extract_strided_slice %6 {offsets = [0, 64], sizes = [16, 32], strides = [1, 1]} : vector<32x160xf32> to vector<16x32xf32>
    %88 = vector.extract_strided_slice %1 {offsets = [4, 0], sizes = [1, 32], strides = [1, 1]} : vector<8x32xf32> to vector<1x32xf32>
    %89 = vector.extract_strided_slice %1 {offsets = [5, 0], sizes = [1, 32], strides = [1, 1]} : vector<8x32xf32> to vector<1x32xf32>
    %90 = vector.broadcast %89 : vector<1x32xf32> to vector<16x32xf32>
    %91 = arith.mulf %87, %90 : vector<16x32xf32>
    %cst_36 = arith.constant dense<0.000000e+00> : vector<16xf32>
    %92 = vector.multi_reduction <add>, %91, %cst_36 [1] : vector<16x32xf32> to vector<16xf32>
    %93 = vector.shape_cast %92 : vector<16xf32> to vector<16x1xf32>
    %cst_37 = arith.constant dense<0.000000e+00> : vector<1x16xf32>
    %94 = tpu.matmul %88, %87, %cst_37 {dimension_numbers = #tpu.dot_dimension_numbers<[1], [1], [0], [0], [0, 0, 1, 0], [], []>} : vector<1x32xf32>, vector<16x32xf32>, vector<1x16xf32> -> vector<1x16xf32>
    %95 = vector.broadcast %93 : vector<16x1xf32> to vector<16x16xf32>
    %96 = vector.broadcast %94 : vector<1x16xf32> to vector<16x16xf32>
    %97 = arith.addf %95, %96 : vector<16x16xf32>
    %cst_38 = arith.constant 0.000000e+00 : f32
    %98 = vector.broadcast %cst_38 : f32 to vector<16x16xf32>
    %99 = arith.cmpf ogt, %97, %98 : vector<16x16xf32>
    %100 = math.exp %97 : vector<16x16xf32>
    %cst_39 = arith.constant 1.000000e+00 : f32
    %101 = vector.broadcast %cst_39 : f32 to vector<16x16xf32>
    %102 = arith.subf %100, %101 : vector<16x16xf32>
    %103 = arith.select %99, %97, %102 : vector<16x16xi1>, vector<16x16xf32>
    %cst_40 = arith.constant -1.000000e+30 : f32
    %104 = vector.broadcast %cst_40 : f32 to vector<16x16xf32>
    %105 = arith.select %86, %103, %104 : vector<16x16xi1>, vector<16x16xf32>
    %cst_41 = arith.constant dense<0xFF800000> : vector<16xf32>
    %106 = vector.multi_reduction <maximumf>, %105, %cst_41 [1] : vector<16x16xf32> to vector<16xf32>
    %107 = vector.shape_cast %106 : vector<16xf32> to vector<16x1xf32>
    %108 = vector.broadcast %107 : vector<16x1xf32> to vector<16x16xf32>
    %109 = arith.subf %105, %108 : vector<16x16xf32>
    %110 = math.exp %109 : vector<16x16xf32>
    %cst_42 = arith.constant 0.000000e+00 : f32
    %111 = vector.broadcast %cst_42 : f32 to vector<16x16xf32>
    %112 = arith.select %86, %110, %111 : vector<16x16xi1>, vector<16x16xf32>
    %cst_43 = arith.constant dense<0.000000e+00> : vector<16xf32>
    %113 = vector.multi_reduction <add>, %112, %cst_43 [1] : vector<16x16xf32> to vector<16xf32>
    %114 = vector.shape_cast %113 : vector<16xf32> to vector<16x1xf32>
    %cst_44 = arith.constant 9.99999968E-21 : f32
    %115 = vector.broadcast %cst_44 : f32 to vector<16x1xf32>
    %116 = arith.maximumf %114, %115 : vector<16x1xf32>
    %117 = tpu.reciprocal %116 {approx = true} : vector<16x1xf32> -> vector<16x1xf32>
    %cst_45 = arith.constant dense<0.000000e+00> : vector<16x32xf32>
    %118 = tpu.matmul %112, %87, %cst_45 {dimension_numbers = #tpu.dot_dimension_numbers<[1], [0], [0], [1], [0, 0, 1, 1], [], []>} : vector<16x16xf32>, vector<16x32xf32>, vector<16x32xf32> -> vector<16x32xf32>
    %119 = vector.broadcast %117 : vector<16x1xf32> to vector<16x32xf32>
    %120 = arith.mulf %118, %119 : vector<16x32xf32>
    %121 = arith.addf %84, %120 : vector<16x32xf32>
    %122 = vector.extract_strided_slice %6 {offsets = [0, 96], sizes = [16, 32], strides = [1, 1]} : vector<32x160xf32> to vector<16x32xf32>
    %123 = vector.extract_strided_slice %1 {offsets = [6, 0], sizes = [1, 32], strides = [1, 1]} : vector<8x32xf32> to vector<1x32xf32>
    %124 = vector.extract_strided_slice %1 {offsets = [7, 0], sizes = [1, 32], strides = [1, 1]} : vector<8x32xf32> to vector<1x32xf32>
    %125 = vector.broadcast %124 : vector<1x32xf32> to vector<16x32xf32>
    %126 = arith.mulf %122, %125 : vector<16x32xf32>
    %cst_46 = arith.constant dense<0.000000e+00> : vector<16xf32>
    %127 = vector.multi_reduction <add>, %126, %cst_46 [1] : vector<16x32xf32> to vector<16xf32>
    %128 = vector.shape_cast %127 : vector<16xf32> to vector<16x1xf32>
    %cst_47 = arith.constant dense<0.000000e+00> : vector<1x16xf32>
    %129 = tpu.matmul %123, %122, %cst_47 {dimension_numbers = #tpu.dot_dimension_numbers<[1], [1], [0], [0], [0, 0, 1, 0], [], []>} : vector<1x32xf32>, vector<16x32xf32>, vector<1x16xf32> -> vector<1x16xf32>
    %130 = vector.broadcast %128 : vector<16x1xf32> to vector<16x16xf32>
    %131 = vector.broadcast %129 : vector<1x16xf32> to vector<16x16xf32>
    %132 = arith.addf %130, %131 : vector<16x16xf32>
    %cst_48 = arith.constant 0.000000e+00 : f32
    %133 = vector.broadcast %cst_48 : f32 to vector<16x16xf32>
    %134 = arith.cmpf ogt, %132, %133 : vector<16x16xf32>
    %135 = math.exp %132 : vector<16x16xf32>
    %cst_49 = arith.constant 1.000000e+00 : f32
    %136 = vector.broadcast %cst_49 : f32 to vector<16x16xf32>
    %137 = arith.subf %135, %136 : vector<16x16xf32>
    %138 = arith.select %134, %132, %137 : vector<16x16xi1>, vector<16x16xf32>
    %cst_50 = arith.constant -1.000000e+30 : f32
    %139 = vector.broadcast %cst_50 : f32 to vector<16x16xf32>
    %140 = arith.select %86, %138, %139 : vector<16x16xi1>, vector<16x16xf32>
    %cst_51 = arith.constant dense<0xFF800000> : vector<16xf32>
    %141 = vector.multi_reduction <maximumf>, %140, %cst_51 [1] : vector<16x16xf32> to vector<16xf32>
    %142 = vector.shape_cast %141 : vector<16xf32> to vector<16x1xf32>
    %143 = vector.broadcast %142 : vector<16x1xf32> to vector<16x16xf32>
    %144 = arith.subf %140, %143 : vector<16x16xf32>
    %145 = math.exp %144 : vector<16x16xf32>
    %cst_52 = arith.constant 0.000000e+00 : f32
    %146 = vector.broadcast %cst_52 : f32 to vector<16x16xf32>
    %147 = arith.select %86, %145, %146 : vector<16x16xi1>, vector<16x16xf32>
    %cst_53 = arith.constant dense<0.000000e+00> : vector<16xf32>
    %148 = vector.multi_reduction <add>, %147, %cst_53 [1] : vector<16x16xf32> to vector<16xf32>
    %149 = vector.shape_cast %148 : vector<16xf32> to vector<16x1xf32>
    %cst_54 = arith.constant 9.99999968E-21 : f32
    %150 = vector.broadcast %cst_54 : f32 to vector<16x1xf32>
    %151 = arith.maximumf %149, %150 : vector<16x1xf32>
    %152 = tpu.reciprocal %151 {approx = true} : vector<16x1xf32> -> vector<16x1xf32>
    %cst_55 = arith.constant dense<0.000000e+00> : vector<16x32xf32>
    %153 = tpu.matmul %147, %122, %cst_55 {dimension_numbers = #tpu.dot_dimension_numbers<[1], [0], [0], [1], [0, 0, 1, 1], [], []>} : vector<16x16xf32>, vector<16x32xf32>, vector<16x32xf32> -> vector<16x32xf32>
    %154 = vector.broadcast %152 : vector<16x1xf32> to vector<16x32xf32>
    %155 = arith.mulf %153, %154 : vector<16x32xf32>
    %cst_56 = arith.constant dense<0.000000e+00> : vector<16x32xf32>
    %156 = tpu.matmul %147, %155, %cst_56 {dimension_numbers = #tpu.dot_dimension_numbers<[1], [0], [0], [1], [0, 0, 1, 1], [], []>} : vector<16x16xf32>, vector<16x32xf32>, vector<16x32xf32> -> vector<16x32xf32>
    %157 = vector.broadcast %152 : vector<16x1xf32> to vector<16x32xf32>
    %158 = arith.mulf %156, %157 : vector<16x32xf32>
    %159 = arith.addf %121, %158 : vector<16x32xf32>
    %160 = arith.addf %8, %10 : vector<16x16xf32>
    %161 = vector.extract_strided_slice %6 {offsets = [0, 128], sizes = [16, 32], strides = [1, 1]} : vector<32x160xf32> to vector<16x32xf32>
    %cst_57 = arith.constant dense<0.000000e+00> : vector<16x32xf32>
    %162 = tpu.matmul %160, %161, %cst_57 {dimension_numbers = #tpu.dot_dimension_numbers<[1], [0], [0], [1], [0, 0, 1, 1], [], []>} : vector<16x16xf32>, vector<16x32xf32>, vector<16x32xf32> -> vector<16x32xf32>
    %cst_58 = arith.constant 1.000000e-01 : f32
    %163 = vector.broadcast %cst_58 : f32 to vector<16x32xf32>
    %164 = arith.mulf %163, %162 : vector<16x32xf32>
    %165 = arith.subf %161, %164 : vector<16x32xf32>
    %cst_59 = arith.constant dense<0.000000e+00> : vector<16x32xf32>
    %166 = tpu.matmul %160, %165, %cst_59 {dimension_numbers = #tpu.dot_dimension_numbers<[1], [0], [0], [1], [0, 0, 1, 1], [], []>} : vector<16x16xf32>, vector<16x32xf32>, vector<16x32xf32> -> vector<16x32xf32>
    %cst_60 = arith.constant 1.000000e-01 : f32
    %167 = vector.broadcast %cst_60 : f32 to vector<16x32xf32>
    %168 = arith.mulf %167, %166 : vector<16x32xf32>
    %169 = arith.subf %165, %168 : vector<16x32xf32>
    %cst_61 = arith.constant dense<0.000000e+00> : vector<16x32xf32>
    %170 = tpu.matmul %160, %169, %cst_61 {dimension_numbers = #tpu.dot_dimension_numbers<[1], [0], [0], [1], [0, 0, 1, 1], [], []>} : vector<16x16xf32>, vector<16x32xf32>, vector<16x32xf32> -> vector<16x32xf32>
    %cst_62 = arith.constant 1.000000e-01 : f32
    %171 = vector.broadcast %cst_62 : f32 to vector<16x32xf32>
    %172 = arith.mulf %171, %170 : vector<16x32xf32>
    %173 = arith.subf %169, %172 : vector<16x32xf32>
    %cst_63 = arith.constant dense<0.000000e+00> : vector<16x32xf32>
    %174 = tpu.matmul %160, %173, %cst_63 {dimension_numbers = #tpu.dot_dimension_numbers<[1], [0], [0], [1], [0, 0, 1, 1], [], []>} : vector<16x16xf32>, vector<16x32xf32>, vector<16x32xf32> -> vector<16x32xf32>
    %cst_64 = arith.constant 1.000000e-01 : f32
    %175 = vector.broadcast %cst_64 : f32 to vector<16x32xf32>
    %176 = arith.mulf %175, %174 : vector<16x32xf32>
    %177 = arith.subf %173, %176 : vector<16x32xf32>
    %cst_65 = arith.constant dense<0.000000e+00> : vector<16x32xf32>
    %178 = tpu.matmul %160, %177, %cst_65 {dimension_numbers = #tpu.dot_dimension_numbers<[1], [0], [0], [1], [0, 0, 1, 1], [], []>} : vector<16x16xf32>, vector<16x32xf32>, vector<16x32xf32> -> vector<16x32xf32>
    %cst_66 = arith.constant 1.000000e-01 : f32
    %179 = vector.broadcast %cst_66 : f32 to vector<16x32xf32>
    %180 = arith.mulf %179, %178 : vector<16x32xf32>
    %181 = arith.subf %177, %180 : vector<16x32xf32>
    %182 = arith.addf %159, %181 : vector<16x32xf32>
    %cst_67 = arith.constant 0.000000e+00 : f32
    %183 = vector.broadcast %cst_67 : f32 to vector<16x32xf32>
    %184 = arith.maximumf %182, %183 : vector<16x32xf32>
    %c1 = arith.constant 1 : index
    %c0_68 = arith.constant 0 : index
    %c0_69 = arith.constant 0 : index
    %185 = vector.load %arg2[%c1, %c0_68, %c0_69] : memref<2x16x16xf32, #tpu.memory_space<vmem>>, vector<1x16x16xf32>
    %186 = vector.shape_cast %185 : vector<1x16x16xf32> to vector<16x16xf32>
    %c1_70 = arith.constant 1 : index
    %c0_71 = arith.constant 0 : index
    %c0_72 = arith.constant 0 : index
    %187 = vector.load %arg3[%c1_70, %c0_71, %c0_72] : memref<2x16x16xf32, #tpu.memory_space<vmem>>, vector<1x16x16xf32>
    %188 = vector.shape_cast %187 : vector<1x16x16xf32> to vector<16x16xf32>
    %cst_73 = arith.constant 0.000000e+00 : f32
    %189 = vector.broadcast %cst_73 : f32 to vector<16x16xf32>
    %190 = arith.cmpf one, %186, %189 : vector<16x16xf32>
    %191 = vector.extract_strided_slice %6 {offsets = [16, 0], sizes = [16, 32], strides = [1, 1]} : vector<32x160xf32> to vector<16x32xf32>
    %192 = vector.extract_strided_slice %1 {offsets = [0, 0], sizes = [1, 32], strides = [1, 1]} : vector<8x32xf32> to vector<1x32xf32>
    %193 = vector.extract_strided_slice %1 {offsets = [1, 0], sizes = [1, 32], strides = [1, 1]} : vector<8x32xf32> to vector<1x32xf32>
    %194 = vector.broadcast %193 : vector<1x32xf32> to vector<16x32xf32>
    %195 = arith.mulf %191, %194 : vector<16x32xf32>
    %cst_74 = arith.constant dense<0.000000e+00> : vector<16xf32>
    %196 = vector.multi_reduction <add>, %195, %cst_74 [1] : vector<16x32xf32> to vector<16xf32>
    %197 = vector.shape_cast %196 : vector<16xf32> to vector<16x1xf32>
    %cst_75 = arith.constant dense<0.000000e+00> : vector<1x16xf32>
    %198 = tpu.matmul %192, %191, %cst_75 {dimension_numbers = #tpu.dot_dimension_numbers<[1], [1], [0], [0], [0, 0, 1, 0], [], []>} : vector<1x32xf32>, vector<16x32xf32>, vector<1x16xf32> -> vector<1x16xf32>
    %199 = vector.broadcast %197 : vector<16x1xf32> to vector<16x16xf32>
    %200 = vector.broadcast %198 : vector<1x16xf32> to vector<16x16xf32>
    %201 = arith.addf %199, %200 : vector<16x16xf32>
    %cst_76 = arith.constant 0.000000e+00 : f32
    %202 = vector.broadcast %cst_76 : f32 to vector<16x16xf32>
    %203 = arith.cmpf ogt, %201, %202 : vector<16x16xf32>
    %204 = math.exp %201 : vector<16x16xf32>
    %cst_77 = arith.constant 1.000000e+00 : f32
    %205 = vector.broadcast %cst_77 : f32 to vector<16x16xf32>
    %206 = arith.subf %204, %205 : vector<16x16xf32>
    %207 = arith.select %203, %201, %206 : vector<16x16xi1>, vector<16x16xf32>
    %cst_78 = arith.constant -1.000000e+30 : f32
    %208 = vector.broadcast %cst_78 : f32 to vector<16x16xf32>
    %209 = arith.select %190, %207, %208 : vector<16x16xi1>, vector<16x16xf32>
    %cst_79 = arith.constant dense<0xFF800000> : vector<16xf32>
    %210 = vector.multi_reduction <maximumf>, %209, %cst_79 [1] : vector<16x16xf32> to vector<16xf32>
    %211 = vector.shape_cast %210 : vector<16xf32> to vector<16x1xf32>
    %212 = vector.broadcast %211 : vector<16x1xf32> to vector<16x16xf32>
    %213 = arith.subf %209, %212 : vector<16x16xf32>
    %214 = math.exp %213 : vector<16x16xf32>
    %cst_80 = arith.constant 0.000000e+00 : f32
    %215 = vector.broadcast %cst_80 : f32 to vector<16x16xf32>
    %216 = arith.select %190, %214, %215 : vector<16x16xi1>, vector<16x16xf32>
    %cst_81 = arith.constant dense<0.000000e+00> : vector<16xf32>
    %217 = vector.multi_reduction <add>, %216, %cst_81 [1] : vector<16x16xf32> to vector<16xf32>
    %218 = vector.shape_cast %217 : vector<16xf32> to vector<16x1xf32>
    %cst_82 = arith.constant 9.99999968E-21 : f32
    %219 = vector.broadcast %cst_82 : f32 to vector<16x1xf32>
    %220 = arith.maximumf %218, %219 : vector<16x1xf32>
    %221 = tpu.reciprocal %220 {approx = true} : vector<16x1xf32> -> vector<16x1xf32>
    %cst_83 = arith.constant dense<0.000000e+00> : vector<16x32xf32>
    %222 = tpu.matmul %216, %191, %cst_83 {dimension_numbers = #tpu.dot_dimension_numbers<[1], [0], [0], [1], [0, 0, 1, 1], [], []>} : vector<16x16xf32>, vector<16x32xf32>, vector<16x32xf32> -> vector<16x32xf32>
    %223 = vector.broadcast %221 : vector<16x1xf32> to vector<16x32xf32>
    %224 = arith.mulf %222, %223 : vector<16x32xf32>
    %225 = vector.extract_strided_slice %6 {offsets = [16, 32], sizes = [16, 32], strides = [1, 1]} : vector<32x160xf32> to vector<16x32xf32>
    %226 = vector.extract_strided_slice %1 {offsets = [2, 0], sizes = [1, 32], strides = [1, 1]} : vector<8x32xf32> to vector<1x32xf32>
    %227 = vector.extract_strided_slice %1 {offsets = [3, 0], sizes = [1, 32], strides = [1, 1]} : vector<8x32xf32> to vector<1x32xf32>
    %228 = vector.broadcast %227 : vector<1x32xf32> to vector<16x32xf32>
    %229 = arith.mulf %225, %228 : vector<16x32xf32>
    %cst_84 = arith.constant dense<0.000000e+00> : vector<16xf32>
    %230 = vector.multi_reduction <add>, %229, %cst_84 [1] : vector<16x32xf32> to vector<16xf32>
    %231 = vector.shape_cast %230 : vector<16xf32> to vector<16x1xf32>
    %cst_85 = arith.constant dense<0.000000e+00> : vector<1x16xf32>
    %232 = tpu.matmul %226, %225, %cst_85 {dimension_numbers = #tpu.dot_dimension_numbers<[1], [1], [0], [0], [0, 0, 1, 0], [], []>} : vector<1x32xf32>, vector<16x32xf32>, vector<1x16xf32> -> vector<1x16xf32>
    %233 = vector.broadcast %231 : vector<16x1xf32> to vector<16x16xf32>
    %234 = vector.broadcast %232 : vector<1x16xf32> to vector<16x16xf32>
    %235 = arith.addf %233, %234 : vector<16x16xf32>
    %cst_86 = arith.constant 0.000000e+00 : f32
    %236 = vector.broadcast %cst_86 : f32 to vector<16x16xf32>
    %237 = arith.cmpf ogt, %235, %236 : vector<16x16xf32>
    %238 = math.exp %235 : vector<16x16xf32>
    %cst_87 = arith.constant 1.000000e+00 : f32
    %239 = vector.broadcast %cst_87 : f32 to vector<16x16xf32>
    %240 = arith.subf %238, %239 : vector<16x16xf32>
    %241 = arith.select %237, %235, %240 : vector<16x16xi1>, vector<16x16xf32>
    %cst_88 = arith.constant -1.000000e+30 : f32
    %242 = vector.broadcast %cst_88 : f32 to vector<16x16xf32>
    %243 = arith.select %190, %241, %242 : vector<16x16xi1>, vector<16x16xf32>
    %cst_89 = arith.constant dense<0xFF800000> : vector<16xf32>
    %244 = vector.multi_reduction <maximumf>, %243, %cst_89 [1] : vector<16x16xf32> to vector<16xf32>
    %245 = vector.shape_cast %244 : vector<16xf32> to vector<16x1xf32>
    %246 = vector.broadcast %245 : vector<16x1xf32> to vector<16x16xf32>
    %247 = arith.subf %243, %246 : vector<16x16xf32>
    %248 = math.exp %247 : vector<16x16xf32>
    %cst_90 = arith.constant 0.000000e+00 : f32
    %249 = vector.broadcast %cst_90 : f32 to vector<16x16xf32>
    %250 = arith.select %190, %248, %249 : vector<16x16xi1>, vector<16x16xf32>
    %cst_91 = arith.constant dense<0.000000e+00> : vector<16xf32>
    %251 = vector.multi_reduction <add>, %250, %cst_91 [1] : vector<16x16xf32> to vector<16xf32>
    %252 = vector.shape_cast %251 : vector<16xf32> to vector<16x1xf32>
    %cst_92 = arith.constant 9.99999968E-21 : f32
    %253 = vector.broadcast %cst_92 : f32 to vector<16x1xf32>
    %254 = arith.maximumf %252, %253 : vector<16x1xf32>
    %255 = tpu.reciprocal %254 {approx = true} : vector<16x1xf32> -> vector<16x1xf32>
    %cst_93 = arith.constant dense<0.000000e+00> : vector<16x32xf32>
    %256 = tpu.matmul %250, %225, %cst_93 {dimension_numbers = #tpu.dot_dimension_numbers<[1], [0], [0], [1], [0, 0, 1, 1], [], []>} : vector<16x16xf32>, vector<16x32xf32>, vector<16x32xf32> -> vector<16x32xf32>
    %257 = vector.broadcast %255 : vector<16x1xf32> to vector<16x32xf32>
    %258 = arith.mulf %256, %257 : vector<16x32xf32>
    %cst_94 = arith.constant dense<0.000000e+00> : vector<16x32xf32>
    %259 = tpu.matmul %250, %258, %cst_94 {dimension_numbers = #tpu.dot_dimension_numbers<[1], [0], [0], [1], [0, 0, 1, 1], [], []>} : vector<16x16xf32>, vector<16x32xf32>, vector<16x32xf32> -> vector<16x32xf32>
    %260 = vector.broadcast %255 : vector<16x1xf32> to vector<16x32xf32>
    %261 = arith.mulf %259, %260 : vector<16x32xf32>
    %262 = arith.addf %224, %261 : vector<16x32xf32>
    %cst_95 = arith.constant 0.000000e+00 : f32
    %263 = vector.broadcast %cst_95 : f32 to vector<16x16xf32>
    %264 = arith.cmpf one, %188, %263 : vector<16x16xf32>
    %265 = vector.extract_strided_slice %6 {offsets = [16, 64], sizes = [16, 32], strides = [1, 1]} : vector<32x160xf32> to vector<16x32xf32>
    %266 = vector.extract_strided_slice %1 {offsets = [4, 0], sizes = [1, 32], strides = [1, 1]} : vector<8x32xf32> to vector<1x32xf32>
    %267 = vector.extract_strided_slice %1 {offsets = [5, 0], sizes = [1, 32], strides = [1, 1]} : vector<8x32xf32> to vector<1x32xf32>
    %268 = vector.broadcast %267 : vector<1x32xf32> to vector<16x32xf32>
    %269 = arith.mulf %265, %268 : vector<16x32xf32>
    %cst_96 = arith.constant dense<0.000000e+00> : vector<16xf32>
    %270 = vector.multi_reduction <add>, %269, %cst_96 [1] : vector<16x32xf32> to vector<16xf32>
    %271 = vector.shape_cast %270 : vector<16xf32> to vector<16x1xf32>
    %cst_97 = arith.constant dense<0.000000e+00> : vector<1x16xf32>
    %272 = tpu.matmul %266, %265, %cst_97 {dimension_numbers = #tpu.dot_dimension_numbers<[1], [1], [0], [0], [0, 0, 1, 0], [], []>} : vector<1x32xf32>, vector<16x32xf32>, vector<1x16xf32> -> vector<1x16xf32>
    %273 = vector.broadcast %271 : vector<16x1xf32> to vector<16x16xf32>
    %274 = vector.broadcast %272 : vector<1x16xf32> to vector<16x16xf32>
    %275 = arith.addf %273, %274 : vector<16x16xf32>
    %cst_98 = arith.constant 0.000000e+00 : f32
    %276 = vector.broadcast %cst_98 : f32 to vector<16x16xf32>
    %277 = arith.cmpf ogt, %275, %276 : vector<16x16xf32>
    %278 = math.exp %275 : vector<16x16xf32>
    %cst_99 = arith.constant 1.000000e+00 : f32
    %279 = vector.broadcast %cst_99 : f32 to vector<16x16xf32>
    %280 = arith.subf %278, %279 : vector<16x16xf32>
    %281 = arith.select %277, %275, %280 : vector<16x16xi1>, vector<16x16xf32>
    %cst_100 = arith.constant -1.000000e+30 : f32
    %282 = vector.broadcast %cst_100 : f32 to vector<16x16xf32>
    %283 = arith.select %264, %281, %282 : vector<16x16xi1>, vector<16x16xf32>
    %cst_101 = arith.constant dense<0xFF800000> : vector<16xf32>
    %284 = vector.multi_reduction <maximumf>, %283, %cst_101 [1] : vector<16x16xf32> to vector<16xf32>
    %285 = vector.shape_cast %284 : vector<16xf32> to vector<16x1xf32>
    %286 = vector.broadcast %285 : vector<16x1xf32> to vector<16x16xf32>
    %287 = arith.subf %283, %286 : vector<16x16xf32>
    %288 = math.exp %287 : vector<16x16xf32>
    %cst_102 = arith.constant 0.000000e+00 : f32
    %289 = vector.broadcast %cst_102 : f32 to vector<16x16xf32>
    %290 = arith.select %264, %288, %289 : vector<16x16xi1>, vector<16x16xf32>
    %cst_103 = arith.constant dense<0.000000e+00> : vector<16xf32>
    %291 = vector.multi_reduction <add>, %290, %cst_103 [1] : vector<16x16xf32> to vector<16xf32>
    %292 = vector.shape_cast %291 : vector<16xf32> to vector<16x1xf32>
    %cst_104 = arith.constant 9.99999968E-21 : f32
    %293 = vector.broadcast %cst_104 : f32 to vector<16x1xf32>
    %294 = arith.maximumf %292, %293 : vector<16x1xf32>
    %295 = tpu.reciprocal %294 {approx = true} : vector<16x1xf32> -> vector<16x1xf32>
    %cst_105 = arith.constant dense<0.000000e+00> : vector<16x32xf32>
    %296 = tpu.matmul %290, %265, %cst_105 {dimension_numbers = #tpu.dot_dimension_numbers<[1], [0], [0], [1], [0, 0, 1, 1], [], []>} : vector<16x16xf32>, vector<16x32xf32>, vector<16x32xf32> -> vector<16x32xf32>
    %297 = vector.broadcast %295 : vector<16x1xf32> to vector<16x32xf32>
    %298 = arith.mulf %296, %297 : vector<16x32xf32>
    %299 = arith.addf %262, %298 : vector<16x32xf32>
    %300 = vector.extract_strided_slice %6 {offsets = [16, 96], sizes = [16, 32], strides = [1, 1]} : vector<32x160xf32> to vector<16x32xf32>
    %301 = vector.extract_strided_slice %1 {offsets = [6, 0], sizes = [1, 32], strides = [1, 1]} : vector<8x32xf32> to vector<1x32xf32>
    %302 = vector.extract_strided_slice %1 {offsets = [7, 0], sizes = [1, 32], strides = [1, 1]} : vector<8x32xf32> to vector<1x32xf32>
    %303 = vector.broadcast %302 : vector<1x32xf32> to vector<16x32xf32>
    %304 = arith.mulf %300, %303 : vector<16x32xf32>
    %cst_106 = arith.constant dense<0.000000e+00> : vector<16xf32>
    %305 = vector.multi_reduction <add>, %304, %cst_106 [1] : vector<16x32xf32> to vector<16xf32>
    %306 = vector.shape_cast %305 : vector<16xf32> to vector<16x1xf32>
    %cst_107 = arith.constant dense<0.000000e+00> : vector<1x16xf32>
    %307 = tpu.matmul %301, %300, %cst_107 {dimension_numbers = #tpu.dot_dimension_numbers<[1], [1], [0], [0], [0, 0, 1, 0], [], []>} : vector<1x32xf32>, vector<16x32xf32>, vector<1x16xf32> -> vector<1x16xf32>
    %308 = vector.broadcast %306 : vector<16x1xf32> to vector<16x16xf32>
    %309 = vector.broadcast %307 : vector<1x16xf32> to vector<16x16xf32>
    %310 = arith.addf %308, %309 : vector<16x16xf32>
    %cst_108 = arith.constant 0.000000e+00 : f32
    %311 = vector.broadcast %cst_108 : f32 to vector<16x16xf32>
    %312 = arith.cmpf ogt, %310, %311 : vector<16x16xf32>
    %313 = math.exp %310 : vector<16x16xf32>
    %cst_109 = arith.constant 1.000000e+00 : f32
    %314 = vector.broadcast %cst_109 : f32 to vector<16x16xf32>
    %315 = arith.subf %313, %314 : vector<16x16xf32>
    %316 = arith.select %312, %310, %315 : vector<16x16xi1>, vector<16x16xf32>
    %cst_110 = arith.constant -1.000000e+30 : f32
    %317 = vector.broadcast %cst_110 : f32 to vector<16x16xf32>
    %318 = arith.select %264, %316, %317 : vector<16x16xi1>, vector<16x16xf32>
    %cst_111 = arith.constant dense<0xFF800000> : vector<16xf32>
    %319 = vector.multi_reduction <maximumf>, %318, %cst_111 [1] : vector<16x16xf32> to vector<16xf32>
    %320 = vector.shape_cast %319 : vector<16xf32> to vector<16x1xf32>
    %321 = vector.broadcast %320 : vector<16x1xf32> to vector<16x16xf32>
    %322 = arith.subf %318, %321 : vector<16x16xf32>
    %323 = math.exp %322 : vector<16x16xf32>
    %cst_112 = arith.constant 0.000000e+00 : f32
    %324 = vector.broadcast %cst_112 : f32 to vector<16x16xf32>
    %325 = arith.select %264, %323, %324 : vector<16x16xi1>, vector<16x16xf32>
    %cst_113 = arith.constant dense<0.000000e+00> : vector<16xf32>
    %326 = vector.multi_reduction <add>, %325, %cst_113 [1] : vector<16x16xf32> to vector<16xf32>
    %327 = vector.shape_cast %326 : vector<16xf32> to vector<16x1xf32>
    %cst_114 = arith.constant 9.99999968E-21 : f32
    %328 = vector.broadcast %cst_114 : f32 to vector<16x1xf32>
    %329 = arith.maximumf %327, %328 : vector<16x1xf32>
    %330 = tpu.reciprocal %329 {approx = true} : vector<16x1xf32> -> vector<16x1xf32>
    %cst_115 = arith.constant dense<0.000000e+00> : vector<16x32xf32>
    %331 = tpu.matmul %325, %300, %cst_115 {dimension_numbers = #tpu.dot_dimension_numbers<[1], [0], [0], [1], [0, 0, 1, 1], [], []>} : vector<16x16xf32>, vector<16x32xf32>, vector<16x32xf32> -> vector<16x32xf32>
    %332 = vector.broadcast %330 : vector<16x1xf32> to vector<16x32xf32>
    %333 = arith.mulf %331, %332 : vector<16x32xf32>
    %cst_116 = arith.constant dense<0.000000e+00> : vector<16x32xf32>
    %334 = tpu.matmul %325, %333, %cst_116 {dimension_numbers = #tpu.dot_dimension_numbers<[1], [0], [0], [1], [0, 0, 1, 1], [], []>} : vector<16x16xf32>, vector<16x32xf32>, vector<16x32xf32> -> vector<16x32xf32>
    %335 = vector.broadcast %330 : vector<16x1xf32> to vector<16x32xf32>
    %336 = arith.mulf %334, %335 : vector<16x32xf32>
    %337 = arith.addf %299, %336 : vector<16x32xf32>
    %338 = arith.addf %186, %188 : vector<16x16xf32>
    %339 = vector.extract_strided_slice %6 {offsets = [16, 128], sizes = [16, 32], strides = [1, 1]} : vector<32x160xf32> to vector<16x32xf32>
    %cst_117 = arith.constant dense<0.000000e+00> : vector<16x32xf32>
    %340 = tpu.matmul %338, %339, %cst_117 {dimension_numbers = #tpu.dot_dimension_numbers<[1], [0], [0], [1], [0, 0, 1, 1], [], []>} : vector<16x16xf32>, vector<16x32xf32>, vector<16x32xf32> -> vector<16x32xf32>
    %cst_118 = arith.constant 1.000000e-01 : f32
    %341 = vector.broadcast %cst_118 : f32 to vector<16x32xf32>
    %342 = arith.mulf %341, %340 : vector<16x32xf32>
    %343 = arith.subf %339, %342 : vector<16x32xf32>
    %cst_119 = arith.constant dense<0.000000e+00> : vector<16x32xf32>
    %344 = tpu.matmul %338, %343, %cst_119 {dimension_numbers = #tpu.dot_dimension_numbers<[1], [0], [0], [1], [0, 0, 1, 1], [], []>} : vector<16x16xf32>, vector<16x32xf32>, vector<16x32xf32> -> vector<16x32xf32>
    %cst_120 = arith.constant 1.000000e-01 : f32
    %345 = vector.broadcast %cst_120 : f32 to vector<16x32xf32>
    %346 = arith.mulf %345, %344 : vector<16x32xf32>
    %347 = arith.subf %343, %346 : vector<16x32xf32>
    %cst_121 = arith.constant dense<0.000000e+00> : vector<16x32xf32>
    %348 = tpu.matmul %338, %347, %cst_121 {dimension_numbers = #tpu.dot_dimension_numbers<[1], [0], [0], [1], [0, 0, 1, 1], [], []>} : vector<16x16xf32>, vector<16x32xf32>, vector<16x32xf32> -> vector<16x32xf32>
    %cst_122 = arith.constant 1.000000e-01 : f32
    %349 = vector.broadcast %cst_122 : f32 to vector<16x32xf32>
    %350 = arith.mulf %349, %348 : vector<16x32xf32>
    %351 = arith.subf %347, %350 : vector<16x32xf32>
    %cst_123 = arith.constant dense<0.000000e+00> : vector<16x32xf32>
    %352 = tpu.matmul %338, %351, %cst_123 {dimension_numbers = #tpu.dot_dimension_numbers<[1], [0], [0], [1], [0, 0, 1, 1], [], []>} : vector<16x16xf32>, vector<16x32xf32>, vector<16x32xf32> -> vector<16x32xf32>
    %cst_124 = arith.constant 1.000000e-01 : f32
    %353 = vector.broadcast %cst_124 : f32 to vector<16x32xf32>
    %354 = arith.mulf %353, %352 : vector<16x32xf32>
    %355 = arith.subf %351, %354 : vector<16x32xf32>
    %cst_125 = arith.constant dense<0.000000e+00> : vector<16x32xf32>
    %356 = tpu.matmul %338, %355, %cst_125 {dimension_numbers = #tpu.dot_dimension_numbers<[1], [0], [0], [1], [0, 0, 1, 1], [], []>} : vector<16x16xf32>, vector<16x32xf32>, vector<16x32xf32> -> vector<16x32xf32>
    %cst_126 = arith.constant 1.000000e-01 : f32
    %357 = vector.broadcast %cst_126 : f32 to vector<16x32xf32>
    %358 = arith.mulf %357, %356 : vector<16x32xf32>
    %359 = arith.subf %355, %358 : vector<16x32xf32>
    %360 = arith.addf %337, %359 : vector<16x32xf32>
    %cst_127 = arith.constant 0.000000e+00 : f32
    %361 = vector.broadcast %cst_127 : f32 to vector<16x32xf32>
    %362 = arith.maximumf %360, %361 : vector<16x32xf32>
    %363 = tpu.concatenate %184, %362 in 0 : vector<16x32xf32>, vector<16x32xf32> -> vector<32x32xf32>
    %cst_128 = arith.constant dense<0.000000e+00> : vector<32x128xf32>
    %364 = tpu.matmul %363, %2, %cst_128 {dimension_numbers = #tpu.dot_dimension_numbers<[1], [0], [0], [1], [0, 0, 1, 1], [], []>} : vector<32x32xf32>, vector<32x128xf32>, vector<32x128xf32> -> vector<32x128xf32>
    %365 = vector.broadcast %3 : vector<1x128xf32> to vector<32x128xf32>
    %366 = arith.addf %364, %365 : vector<32x128xf32>
    %cst_129 = arith.constant 0.000000e+00 : f32
    %367 = vector.broadcast %cst_129 : f32 to vector<32x128xf32>
    %368 = arith.subf %367, %366 : vector<32x128xf32>
    %369 = math.exp %368 : vector<32x128xf32>
    %cst_130 = arith.constant 1.000000e+00 : f32
    %370 = vector.broadcast %cst_130 : f32 to vector<32x128xf32>
    %371 = arith.addf %370, %369 : vector<32x128xf32>
    %cst_131 = arith.constant 1.000000e+00 : f32
    %372 = vector.broadcast %cst_131 : f32 to vector<32x128xf32>
    %373 = arith.divf %372, %371 : vector<32x128xf32>
    %374 = vector.shape_cast %373 : vector<32x128xf32> to vector<2x16x128xf32>
    %c0_132 = arith.constant 0 : index
    %c0_133 = arith.constant 0 : index
    %c0_134 = arith.constant 0 : index
    %375 = vector.load %arg5[%c0_132, %c0_133, %c0_134] : memref<2x16x128xf32, #tpu.memory_space<vmem>>, vector<2x16x128xf32>
    tpu.vector_store %arg5[%c0_132, %c0_133, %c0_134], %374 {strides = array<i32>} : memref<2x16x128xf32, #tpu.memory_space<vmem>>, vector<2x16x128xf32>,
    return
  }
  func.func @transform_0(%arg0: i32) -> (i32, i32, i32) {
    %c0_i32 = arith.constant 0 : i32
    %c0_i32_0 = arith.constant 0 : i32
    %c0_i32_1 = arith.constant 0 : i32
    return %arg0, %c0_i32, %c0_i32_0 : i32, i32, i32
  }
  func.func @transform_1(%arg0: i32) -> (i32, i32, i32) {
    %c0_i32 = arith.constant 0 : i32
    %c0_i32_0 = arith.constant 0 : i32
    %c0_i32_1 = arith.constant 0 : i32
    return %arg0, %c0_i32, %c0_i32_0 : i32, i32, i32
  }
  func.func @transform_2(%arg0: i32) -> (i32, i32, i32) {
    %c0_i32 = arith.constant 0 : i32
    %c0_i32_0 = arith.constant 0 : i32
    %c0_i32_1 = arith.constant 0 : i32
    return %arg0, %c0_i32, %c0_i32_0 : i32, i32, i32
  }
  func.func @transform_3(%arg0: i32) -> (i32, i32) {
    %c0_i32 = arith.constant 0 : i32
    %c0_i32_0 = arith.constant 0 : i32
    %c0_i32_1 = arith.constant 0 : i32
    return %c0_i32, %c0_i32_0 : i32, i32
  }
  func.func @transform_4(%arg0: i32) -> (i32, i32, i32) {
    %c0_i32 = arith.constant 0 : i32
    %c0_i32_0 = arith.constant 0 : i32
    %c0_i32_1 = arith.constant 0 : i32
    return %arg0, %c0_i32, %c0_i32_0 : i32, i32, i32
  }
}

</mosaic_0001>

<bundles_post_ra>
// kernel: network_forward.1
= control target key start
LH: loop header
LB: loop body
LE: loop exit
PB: predicated region body
PF: predicated region fallthrough
CT: control target
= control target key end

     0   :  { %9 = vsyncpa [#allocation3], 0  ;;  %s3108_s0 = inlined_call_operand.vmem [shape: f32[4,16,8], index: 0, kind: input, shape index: {}]   ;;  %s3109_s1 = inlined_call_operand.vmem [shape: f32[4,16,16], index: 1, kind: input, shape index: {}]   ;;  %s3110_s2 = inlined_call_operand.hbm [shape: f32[4,16,16], index: 2, kind: input, shape index: {}]   ;;  %s3111_s3 = inlined_call_operand.hbm [shape: f32[49,160], index: 3, kind: input, shape index: {}]   ;;  %s3112_s4 = inlined_call_operand.vmem [shape: f32[4,16,128], index: 4, kind: output, shape index: {}]  }
   0x1   :  { %11 = vsyncpa [#allocation3 + $0x1], 0 }
   0x2   :  { %12 = vsyncpa [#allocation5], 0  ;;  %s2389_s15 = smov 0   ;;  %s2391_s16 = smov 0  }
   0x3   :  { %s2393_s17 = smov 0   ;;  %s2395_s18 = smov 0  }
   0x4 LB: > { %s1957_s19 = sadd.s32 4294967295, %s2354_s18   ;;  %p90_p0 = scmp.ne.s32.totalorder %s2346_s16, %s2342_s15  ;;  %s2354_s18 = sphi %s2395_s18, %s3120_s18   ;;  %s2350_s17 = sphi %s2393_s17, %s3119_s17   ;;  %s2346_s16 = sphi %s2391_s16, %s3118_s16   ;;  %s2342_s15 = sphi %s2389_s15, %s3117_s15  }
   0x5   : > { %p2411_p1 = scmp.eq.s32.totalorder %s1957_s19, 0  ;;  %p1959_p2 = scmp.ge.s32.totalorder %s2354_s18, 1 }
   0x6   : > { %p148_p3 = scmp.lt.s32.totalorder %s2354_s18, 3  ;;  %s159_s24 = sshll.u32 %s3111_s3, 4  ;;  %s160_s24 = int_to_ptr.hbm [resolvable:$true] %s159_s24 }
   0x7   : > { %p2419_p4 = por %p2411_p1, %p90_p0  ;;  %s2356_s26 = smov [#allocation4]  }
   0x8   : > { %p2426_p5 = pnand %p1959_p2, %p148_p3  ;;  %s161_s27 = sshll.u32 %s2356_s26, 4  ;;  %s162_s27 = int_to_ptr.vmem [resolvable:$true] %s161_s27 }
   0x9   : > { %s2435_s28 = sadd.s32 1, %s2354_s18   ;;  %s2357_s29 = smov 256  }
   0xa   : > { %p2093_p6 = pneg %p2426_p5  ;;  %s2358_s30 = smov 16  }
   0xb   : > { %s74_s5 = ssub.s32 %s2354_s18, %s2435_s28  ;;  %s77_s6 = sadd.s32 1, %s2350_s17 }
   0xc   : > { %p2094_p7 = pnand %p2093_p6, %p2411_p1  ;;  %p75_p8 = scmp.eq.s32.totalorder %s74_s5, 0 }
   0xd   : > { %p84_p9 = scmp.ne.s32.totalorder %s2350_s17, %s2346_s16  ;;  %p85_p10 = scmp.eq.s32.totalorder %s2354_s18, 0 }
   0xe   : > { %2096 = dma.hbm_to_vmem [thread:$0]  (!%p2094_p7), %s160_s24, 1792, %s162_s27, [#allocation5], %s2357_s29, %s2357_s29, %s2358_s30  }
   0xf   : > { %p2102_p11 = scmp.lt.s32.totalorder %s2354_s18, 2  ;;  %p86_p12 = por %p85_p10, %p84_p9 }
  0x10   : > { %s2445_s7 = scalar_select %p75_p8, %s2350_s17, %s77_s6  }
  0x11   : > { %s195_s8 = sand.u32 1, %s2350_s17   ;;  %s2081_s10 = sshll.u32 %s2354_s18, 5 }
  0x12   : > { %s1962_s9 = sshll.u32 %s195_s8, 5  ;;  %s205_s13 = scalar_lea.hbm %s3110_s2, %s2081_s10 }
  0x13   : > { %s199_s14 = scalar_lea.vmem [#allocation2], %s1962_s9  ;;  %s206_s22 = sshll.u32 %s205_s13, 4  ;;  %s207_s22 = int_to_ptr.hbm [resolvable:$true] %s206_s22 }
  0x14   : > { %s208_s15 = sshll.u32 %s199_s14, 4  ;;  %p2452_p13 = pnand %p2102_p11, %p86_p12  ;;  %s209_s15 = int_to_ptr.vmem [resolvable:$true] %s208_s15 }
  0x15   : > { %s196_s24 = scalar_lea.sflag [#allocation3], %s195_s8  ;;  %s2286_s26 = sshra.s32 %s207_s22, 4  ;;  %s2287_s26 = int_to_ptr.hbm [resolvable:$true] %s2286_s26 }
  0x16   : > { %s2288_s27 = scalar_lea.hbm %s2287_s26, 32  ;;  %p2290_p2 = pneg %p2452_p13 }
  0x17   : > { %p2289_p0 = scmp.ne.s32.totalorder %s2287_s26, %s2288_s27  ;;  %s2293_s5 = scalar_lea.hbm %s3110_s2, 64 }
  0x18   : > { %p2294_p7 = scmp.lt.s32.totalorder %s2287_s26, %s3110_s2  ;;  %p2295_p8 = scmp.lt.s32.totalorder %s2293_s5, %s2288_s27 }
  0x19   : > { %p2291_p3 = pnand %p2290_p2, %p2289_p0 }
  0x1a   : > { %p2296_p9 = por %p2295_p8, %p2294_p7 }
  0x1b   : > { %p2292_p6 = pneg %p2291_p3 }
  0x1d   : > { %p2297_p10 = pnand %p2296_p9, %p2292_p6 }
  0x1f   : > { %2300 = shalt.err (!%p2297_p10)
}
  0x20   : > { %s2359_s8 = smov 128   ;;  %s2360_s10 = smov 8  }
  0x21   : > { %2100 = dma.hbm_to_vmem [thread:$0]  (!%p2452_p13), %s207_s22, 512, %s209_s15, %s196_s24, %s2359_s8, %s2359_s8, %s2360_s10  }
  0x22   : > { %220 = sbr.rel (%p2426_p5) target bundleno = 2497 (0x9c1), region = 36  ;;  %s222_s11 = sand.u32 (!%p2426_p5), 1, %s2346_s16  }
  0x23   : > { %s1967_s12 = sshll.u32 (!%p2426_p5), %s222_s11, 5  ;;  %s223_s13 = scalar_lea.sflag (!%p2426_p5), [#allocation3], %s222_s11 }
  0x24   : > { %s2469_s14 = scalar_lea.vmem (!%p2426_p5), [#allocation2], %s1967_s12 }
  0x27   : > { %2333 = dma.done.wait (%p2419_p4), %s223_s13, 512  }
  0x28   : > { %2335 = vsyncadd (%p2419_p4), %s223_s13, 4294966784 }
  0x29   : > { %2337 = dma.done.wait (%p2411_p1), [#allocation5], 1792  }
  0x2a   : > { %2339 = vsyncadd (%p2411_p1), [#allocation5], 4294965504  ;;  %s1969_s25 = sshll.u32 %s1957_s19, 1  ;;  %vm304_vm0 = vcmask 64512   ;;  %v292_v0 = vld [vmem:[#allocation4] sm:$0xff]  ;;  %v2489_v2 = vld [vmem:[#allocation4 + $0x10] sm:$0xff] }
  0x2b   : > { %p271_p5 = scmp.lt.s32.totalorder %s1969_s25, 3  ;;  %332 = vmatpush.msra.mxu0 %v292_v0  ;;  %v491_v3 = vperm.slane %v2489_v2, 3  ;;  %s2361_s18 = smov 32   ;;  %vm384_vm1 = vcmask 261120   ;;  %v2532_v12 = vperm.slane %v2489_v2, 1  ;;  %v512_v23 = vrot.slane %v2489_v2, 2 }
  0x2c   : > { %s2362_s19 = smov 96   ;;  %vm435_vm4 = vcmask 130048   ;;  %s2363_s27 = smov 64   ;;  %v644_v44 = vperm.slane %v2489_v2, 5 }
  0x2d   : > { %s3122_s25 = smov (!%p271_p5, %s1969_s25), 3  ;;  %493 = vrot.lane.b32.xlu1 %v491_v3, %s2361_s18 }
  0x2e   : > { %s2481_s15 = sshll.u32 %s3122_s25, 4 }
  0x2f   : > { %s275_s24 = scalar_lea.vmem %s3108_s0, %s2481_s15  ;;  %s2552_s26 = scalar_lea.vmem %s3109_s1, %s2481_s15 }
  0x30   : > { %v2487_v1 = vld [vmem:[%s275_s24] sm:$0xff]  ;;  %v2495_v4 = vld [vmem:[%s275_s24 + $0x8] sm:$0xff]  ;;  %v2499_v5 = vld [vmem:[%s275_s24 + $0x10] sm:$0xff]  ;;  %s3079_s5 = scalar_lea.vmem %s3112_s4, %s2481_s15 }
  0x31   : > { %1978 = vmatmul.msk.f32.vlgmr.msra.gmra.mxu0 %vm304_vm0, %v2487_v1  ;;  %v2503_v6 = vld [vmem:[%s275_s24 + $0x18] sm:$0xff]  ;;  %v2555_v31 = vld [vmem:[%s2552_s26] sm:$0xff]  ;;  %v2562_v38 = vld [vmem:[%s2552_s26 + $0x8] sm:$0xff] }
  0x32   : > { %vm379_vm2 = vcmp.ne.f32.partialorder %v2555_v31, 0.0  ;;  %vm380_vm5 = vcmp.ne.f32.partialorder %v2562_v38, 0.0 }
  0x39   : > { %1979 = vmatmul.msk.f32.gmra.mxu0 %vm304_vm0, %v2495_v4 }
  0x41   : > { %1980 = vmatmul.msk.f32.gmra.mxu0 %vm304_vm0, %v2499_v5 }
  0x49   : > { %1981 = vmatmul.msk.f32.gmra.mxu0 %vm304_vm0, %v2503_v6 }
  0x9f   : > { %v2507_v7 = vpop.permute.xlu1 %493 }
  0xae   : > { %v2509_v8 = vpop.f32.mrf.mxu0 }
  0xaf   : > { %v496_v9 = vmul.f32 %v2507_v7, %v2509_v8  ;;  %v382_v13 = vmul.f32 %v2532_v12, %v2509_v8 }
  0xb1   : > { %500 = vrot.lane.b32.xlu1 %v496_v9, %s2362_s19  ;;  %v385_v14 = vsel %vm384_vm1, %v382_v13, 0.0 }
  0xb6   : > { %v2514_v10 = vpop.f32.mrf.mxu0 }
  0xb7   : > { %515 = vrot.lane.b32.xlu0 %v2514_v10, %s2362_s19  ;;  %1986 = vmatpush.xpose.msk.msra.mxu2 %vm384_vm1, %v2514_v10  ;;  %v497_v11 = vmul.f32 %v2507_v7, %v2514_v10  ;;  %v383_v15 = vmul.f32 %v2532_v12, %v2514_v10 }
  0xb8   : > { %480 = vmatpush.msra.mxu3 %v2514_v10 }
  0xb9   : > { %502 = vrot.lane.b32.xlu2 %v497_v11, %s2362_s19  ;;  %v388_v16 = vsel %vm384_vm1, %v383_v15, 0.0 }
  0xba   : > { %481 = vmatpush.msra.mxu3 %v2509_v8 }
  0xbb   : > { %1987 = vmatpush.xpose.msk.msra.mxu2 %vm384_vm1, %v2509_v8 }
  0xbe   : > { %1988 = vmatmul.msk.f32.vlgmr.msra.gmra.mxu2 %vm384_vm1, %v2489_v2 }
  0xbf   : > { %513 = vrot.lane.b32.xlu0 %v2509_v8, %s2362_s19 }
  0xe2   : > { %386 = vadd.xlane.f32.xlu2 %v385_v14 }
  0xe9   : > { %389 = vadd.xlane.f32.xlu0 %v388_v16 }
 0x113   : > { %v503_v17 = vpop.permute.xlu2 %502 }
 0x114   : > { %v509_v18 = vsel %vm384_vm1, %v503_v17, 0.0 }
 0x115   : > { %510 = vadd.xlane.f32.xlu2 %v509_v18 }
 0x123   : > { %v501_v19 = vpop.permute.xlu1 %500 }
 0x124   : > { %v506_v20 = vsel %vm384_vm1, %v501_v19, 0.0 }
 0x125   : > { %507 = vadd.xlane.f32.xlu1 %v506_v20 }
 0x129   : > { %v516_v21 = vpop.permute.xlu0 %515 }
 0x12a   : > { %1993 = vmatpush.xpose.msk.msrb.mxu2 %vm384_vm1, %v516_v21  ;;  %604 = vmatpush.msrb.mxu3 %v516_v21 }
 0x131   : > { %v514_v22 = vpop.permute.xlu0 %513 }
 0x132   : > { %1994 = vmatpush.xpose.msk.msrb.mxu2 %vm384_vm1, %v514_v22  ;;  %605 = vmatpush.msrb.mxu3 %v514_v22 }
 0x135   : > { %1995 = vmatmul.msk.f32.vlgmr.msrb.gmra.mxu2 %vm384_vm1, %v512_v23 }
 0x141   : > { %v417_v24 = vpop.f32.mrf.mxu2 }
 0x142   : > { %v420_v25 = vperm.slane %v417_v24, 0  ;;  %v293_v24 = vld [vmem:[#allocation4 + $0x8] sm:$0xff] }
 0x143   : > { %361 = vmatpush.msra.mxu1 %v293_v24 }
 0x144   : > { %1982 = vmatmul.msk.f32.vlgmr.msra.gmra.mxu1 %vm304_vm0, %v2487_v1 }
 0x14c   : > { %1983 = vmatmul.msk.f32.gmra.mxu1 %vm304_vm0, %v2495_v4 }
 0x154   : > { %1984 = vmatmul.msk.f32.gmra.mxu1 %vm304_vm0, %v2499_v5 }
 0x155   : > { %v387_v26 = vpop.xlane.xlu2 %386 }
 0x156   : > { %v421_v27 = vadd.f32 %v420_v25, %v387_v26 }
 0x158   : > { %v425_v28 = vmul.f32 1.442695, %v421_v27  ;;  %vm423_vm3 = vcmp.gt.f32.partialorder %v421_v27, 0.0 }
 0x15a   : > { %2144 = vpow2.f32 %v425_v28 }
 0x15c   : > { %v390_v29 = vpop.xlane.xlu0 %389  ;;  %1985 = vmatmul.msk.f32.gmra.mxu1 %vm304_vm0, %v2503_v6 }
 0x15d   : > { %v422_v30 = vadd.f32 %v420_v25, %v390_v29 }
 0x15f   : > { %v427_v32 = vmul.f32 1.442695, %v422_v30  ;;  %vm424_vm6 = vcmp.gt.f32.partialorder %v422_v30, 0.0 }
 0x160   : > { %v2145_v33 = vpop.eup %2144 }
 0x161   : > { %2146 = vpow2.f32 %v427_v32  ;;  %v1989_v34 = vadd.f32 -1.0, %v2145_v33 }
 0x163   : > { %v431_v35 = vsel %vm423_vm3, %v421_v27, %v1989_v34 }
 0x164   : > { %v433_v36 = vsel %vm379_vm2, %v431_v35, -1e+30 }
 0x165   : > { %v436_v37 = vsel %vm435_vm4, %v433_v36, -inf }
 0x166   : > { %437 = vmax.xlane.f32.xlu2 %v436_v37 }
 0x167   : > { %v2147_v39 = vpop.eup %2146 }
 0x168   : > { %v1990_v40 = vadd.f32 -1.0, %v2147_v39 }
 0x16a   : > { %v432_v41 = vsel %vm424_vm6, %v422_v30, %v1990_v40 }
 0x16b   : > { %v434_v42 = vsel %vm380_vm5, %v432_v41, -1e+30 }
 0x16c   : > { %v439_v43 = vsel %vm435_vm4, %v434_v42, -inf }
 0x16d   : > { %440 = vmax.xlane.f32.xlu0 %v439_v43 }
 0x181   : > { %668 = vrot.lane.b32.xlu0 %v2514_v10, %s2363_s27 }
 0x188   : > { %v511_v47 = vpop.xlane.xlu2 %510 }
 0x189   : > { %646 = vrot.lane.b32.xlu0 %v644_v44, %s2363_s27 }
 0x198   : > { %v508_v48 = vpop.xlane.xlu1 %507 }
 0x1b8   : > { %v540_v45 = vpop.f32.mrf.mxu2 }
 0x1b9   : > { %v543_v46 = vperm.slane %v540_v45, 0 }
 0x1bb   : > { %v544_v49 = vadd.f32 %v543_v46, %v508_v48  ;;  %v545_v50 = vadd.f32 %v543_v46, %v511_v47  ;;  %v2637_v48 = vpop.f32.mrf.mxu0 }
 0x1bd   : > { %v548_v51 = vmul.f32 1.442695, %v544_v49  ;;  %v550_v52 = vmul.f32 1.442695, %v545_v50  ;;  %vm546_vm7 = vcmp.gt.f32.partialorder %v544_v49, 0.0  ;;  %vm547_vm8 = vcmp.gt.f32.partialorder %v545_v50, 0.0 }
 0x1bf   : > { %2148 = vpow2.f32 %v548_v51 }
 0x1c0   : > { %2150 = vpow2.f32 %v550_v52 }
 0x1c1   : > { %v2641_v52 = vpop.f32.mrf.mxu1 }
 0x1c5   : > { %v2149_v53 = vpop.eup %2148 }
 0x1c6   : > { %v2151_v54 = vpop.eup %2150  ;;  %v1996_v55 = vadd.f32 -1.0, %v2149_v53 }
 0x1c7   : > { %v1997_v56 = vadd.f32 -1.0, %v2151_v54 }
 0x1c8   : > { %v554_v57 = vsel %vm546_vm7, %v544_v49, %v1996_v55  ;;  %v2645_v55 = vpop.f32.mrf.mxu0 }
 0x1c9   : > { %v556_v58 = vsel %vm379_vm2, %v554_v57, -1e+30  ;;  %v555_v59 = vsel %vm547_vm8, %v545_v50, %v1997_v56 }
 0x1ca   : > { %v558_v60 = vsel %vm435_vm4, %v556_v58, -inf  ;;  %v557_v61 = vsel %vm380_vm5, %v555_v59, -1e+30  ;;  %v366_v59 = vpop.f32.mrf.mxu1 }
 0x1cb   : > { %559 = vmax.xlane.f32.xlu1 %v558_v60  ;;  %v561_v62 = vsel %vm435_vm4, %v557_v61, -inf  ;;  %v791_v60 = vrot.slane %v2489_v2, 6 }
 0x1cc   : > { %562 = vmax.xlane.f32.xlu2 %v561_v62  ;;  %v2659_v62 = vld [vmem:[%s2469_s14] sm:$0xff] }
 0x1cd   : > { %vm642_vm11 = vcmp.ne.f32.partialorder %v2659_v62, 0.0 }
 0x1d9   : > { %v438_v63 = vpop.xlane.xlu2 %437 }
 0x1da   : > { %v442_v0 = vsub.f32 %v433_v36, %v438_v63  ;;  %v665_v36 = vrot.slane %v2489_v2, 4 }
 0x1dc   : > { %v444_v3 = vmul.f32 1.442695, %v442_v0 }
 0x1de   : > { %2152 = vpow2.f32 %v444_v3 }
 0x1e0   : > { %v441_v9 = vpop.xlane.xlu0 %440 }
 0x1e1   : > { %v443_v11 = vsub.f32 %v434_v42, %v441_v9  ;;  %v770_v42 = vperm.slane %v2489_v2, 7 }
 0x1e3   : > { %v446_v13 = vmul.f32 1.442695, %v443_v11  ;;  %v2664_v11 = vadd.f32 %v2659_v62, %v2555_v31 }
 0x1e4   : > { %v2153_v14 = vpop.eup %2152  ;;  %666 = vrot.lane.b32.xlu1 %v2509_v8, %s2363_s27 }
 0x1e5   : > { %2154 = vpow2.f32 %v446_v13  ;;  %v2582_v15 = vsel %vm379_vm2, %v2153_v14, 0.0 }
 0x1e6   : > { %1991 = vmatmul.msk.f32.vlgmr.msra.gmra.mxu3 %vm435_vm4, %v2582_v15 }
 0x1eb   : > { %v2155_v16 = vpop.eup %2154 }
 0x1ec   : > { %792 = vrot.lane.b32.xlu1 %v2509_v8, %s2361_s18  ;;  %v2590_v17 = vsel %vm380_vm5, %v2155_v16, 0.0  ;;  %v2669_v16 = vld [vmem:[%s2469_s14 + $0x8] sm:$0xff] }
 0x1ed   : > { %vm643_vm9 = vcmp.ne.f32.partialorder %v2669_v16, 0.0 }
 0x1ee   : > { %1992 = vmatmul.msk.f32.gmra.mxu3 %vm435_vm4, %v2590_v17 }
 0x1f3   : > { %v2594_v18 = vpop.permute.xlu0 %668 }
 0x1f4   : > { %2002 = vmatpush.xpose.msk.msrb.mxu0 %vm384_vm1, %v2594_v18 }
 0x1fb   : > { %v2598_v19 = vpop.permute.xlu0 %646 }
 0x1fc   : > { %v650_v20 = vmul.f32 %v2598_v19, %v2514_v10  ;;  %v649_v21 = vmul.f32 %v2598_v19, %v2509_v8 }
 0x1fe   : > { %655 = vrot.lane.b32.xlu1 %v650_v20, %s2363_s27  ;;  %653 = vrot.lane.b32.xlu0 %v649_v21, %s2363_s27  ;;  %v2673_v20 = vadd.f32 %v2669_v16, %v2562_v38  ;;  %v1077_v16 = vmul.f32 %v2532_v12, %v2645_v55 }
 0x23e   : > { %v560_v22 = vpop.xlane.xlu1 %559 }
 0x23f   : > { %v564_v25 = vsub.f32 %v556_v58, %v560_v22  ;;  %v563_v26 = vpop.xlane.xlu2 %562 }
 0x240   : > { %v565_v27 = vsub.f32 %v557_v61, %v563_v26 }
 0x241   : > { %v566_v28 = vmul.f32 1.442695, %v564_v25 }
 0x242   : > { %v568_v29 = vmul.f32 1.442695, %v565_v27 }
 0x243   : > { %2156 = vpow2.f32 %v566_v28 }
 0x244   : > { %2158 = vpow2.f32 %v568_v29 }
 0x249   : > { %v2157_v30 = vpop.eup %2156 }
 0x24a   : > { %v2159_v32 = vpop.eup %2158  ;;  %v570_v33 = vsel %vm379_vm2, %v2157_v30, 0.0 }
 0x24b   : > { %1998 = vmatmul.msk.f32.vlgmr.msrb.gmra.mxu3 %vm435_vm4, %v570_v33  ;;  %v571_v34 = vsel %vm380_vm5, %v2159_v32, 0.0  ;;  %v572_v1 = vsel %vm435_vm4, %v570_v33, 0.0 }
 0x24c   : > { %v575_v35 = vsel %vm435_vm4, %v571_v34, 0.0 }
 0x24d   : > { %576 = vadd.xlane.f32.xlu2 %v575_v35 }
 0x253   : > { %1999 = vmatmul.msk.f32.gmra.mxu3 %vm435_vm4, %v571_v34 }
 0x255   : > { %573 = vadd.xlane.f32.xlu2 %v572_v1 }
 0x256   : > { %v667_v4 = vpop.permute.xlu1 %666 }
 0x257   : > { %2003 = vmatpush.xpose.msk.msrb.mxu0 %vm384_vm1, %v667_v4 }
 0x25a   : > { %2004 = vmatmul.msk.f32.vlgmr.msrb.gmra.mxu0 %vm384_vm1, %v665_v36 }
 0x25e   : > { %v793_v37 = vpop.permute.xlu1 %792 }
 0x269   : > { %v2633_v6 = vpop.f32.mrf.mxu3 }
 0x26d   : > { %794 = vrot.lane.b32.xlu2 %v2514_v10, %s2361_s18 }
 0x270   : > { %v656_v5 = vpop.permute.xlu1 %655  ;;  %v654_v39 = vpop.permute.xlu0 %653 }
 0x271   : > { %v662_v40 = vsel %vm384_vm1, %v656_v5, 0.0  ;;  %v659_v41 = vsel %vm384_vm1, %v654_v39, 0.0  ;;  %v2635_v44 = vpop.f32.mrf.mxu3 }
 0x272   : > { %663 = vadd.xlane.f32.xlu1 %v662_v40  ;;  %660 = vadd.xlane.f32.xlu0 %v659_v41 }
 0x286   : > { %772 = vrot.lane.b32.xlu0 %v770_v42, %s2362_s19 }
 0x2c0   : > { %v577_v43 = vpop.xlane.xlu2 %576 }
 0x2c1   : > { %v579_v46 = vmax.f32 %v577_v43, 1e-20 }
 0x2c3   : > { %2160 = vrcp.f32 %v579_v46 }
 0x2c8   : > { %v574_v45 = vpop.xlane.xlu2 %573 }
 0x2c9   : > { %v578_v47 = vmax.f32 %v574_v45, 1e-20  ;;  %v2639_v51 = vpop.eup %2160 }
 0x2cb   : > { %2162 = vrcp.f32 %v578_v47 }
 0x2ce   : > { %v607_v49 = vpop.f32.mrf.mxu3 }
 0x2d0   : > { %v795_v50 = vpop.permute.xlu2 %794 }
 0x2d1   : > { %883 = vmatpush.msra.mxu2 %v795_v50  ;;  %v2643_v53 = vpop.eup %2162 }
 0x2d2   : > { %v613_v57 = vmul.f32 %v2643_v53, %v607_v49 }
 0x2d3   : > { %884 = vmatpush.msra.mxu2 %v793_v37 }
 0x2d6   : > { %v610_v54 = vpop.f32.mrf.mxu3 }
 0x2d7   : > { %v614_v56 = vmul.f32 %v2639_v51, %v610_v54  ;;  %v693_v58 = vpop.f32.mrf.mxu0 }
 0x2d8   : > { %v696_v61 = vperm.slane %v693_v58, 0 }
 0x2d9   : > { %629 = vmatpush.msrb.mxu1 %v614_v56  ;;  %2085 = vmatpush.msra.mxu3 %v614_v56 }
 0x2db   : > { %630 = vmatpush.msrb.mxu1 %v613_v57  ;;  %2086 = vmatpush.msra.mxu3 %v613_v57 }
 0x2dc   : > { %2000 = vmatmul.msk.f32.vlgmr.msrb.gmra.mxu1 %vm435_vm4, %v570_v33  ;;  %2001 = vmatmul.msk.f32.vlgmr.msra.gmra.mxu3 %vm435_vm4, %v571_v34 }
 0x2dd   : > { %757 = vmatpush.msra.mxu1 %v2594_v18  ;;  %2009 = vmatpush.xpose.msk.msrb.mxu3 %vm384_vm1, %v795_v50 }
 0x2df   : > { %758 = vmatpush.msra.mxu1 %v667_v4 }
 0x2e1   : > { %2010 = vmatpush.xpose.msk.msrb.mxu3 %vm384_vm1, %v793_v37 }
 0x2e4   : > { %2011 = vmatmul.msk.f32.vlgmr.msrb.gmra.mxu3 %vm384_vm1, %v791_v60 }
 0x2e5   : > { %943 = vmatpush.msra.mxu3 %v366_v59  ;;  %v664_v63 = vpop.xlane.xlu1 %663  ;;  %v661_v0 = vpop.xlane.xlu0 %660 }
 0x2e6   : > { %v698_v3 = vadd.f32 %v696_v61, %v664_v63  ;;  %v697_v9 = vadd.f32 %v696_v61, %v661_v0 }
 0x2e7   : > { %944 = vmatpush.msra.mxu3 %v2641_v52 }
 0x2e8   : > { %v703_v13 = vmul.f32 1.442695, %v698_v3  ;;  %v701_v14 = vmul.f32 1.442695, %v697_v9  ;;  %vm700_vm10 = vcmp.gt.f32.partialorder %v698_v3, 0.0  ;;  %vm699_vm12 = vcmp.gt.f32.partialorder %v697_v9, 0.0 }
 0x2ea   : > { %2164 = vpow2.f32 %v703_v13 }
 0x2eb   : > { %2166 = vpow2.f32 %v701_v14 }
 0x2ec   : > { %2018 = vmatmul.msk.f32.vlgmr.msra.gmra.mxu3 %vm435_vm4, %v2664_v11 }
 0x2f0   : > { %v2165_v18 = vpop.eup %2164 }
 0x2f1   : > { %v2167_v21 = vpop.eup %2166  ;;  %v2006_v22 = vadd.f32 -1.0, %v2165_v18 }
 0x2f2   : > { %v2005_v31 = vadd.f32 -1.0, %v2167_v21 }
 0x2f3   : > { %v708_v24 = vsel %vm700_vm10, %v698_v3, %v2006_v22 }
 0x2f4   : > { %2019 = vmatmul.msk.f32.gmra.mxu3 %vm435_vm4, %v2673_v20  ;;  %v710_v25 = vsel %vm643_vm9, %v708_v24, -1e+30  ;;  %v707_v26 = vsel %vm699_vm12, %v697_v9, %v2005_v31 }
 0x2f5   : > { %v714_v38 = vsel %vm435_vm4, %v710_v25, -inf  ;;  %v709_v27 = vsel %vm642_vm11, %v707_v26, -1e+30 }
 0x2f6   : > { %715 = vmax.xlane.f32.xlu1 %v714_v38  ;;  %v711_v28 = vsel %vm435_vm4, %v709_v27, -inf }
 0x2f7   : > { %712 = vmax.xlane.f32.xlu2 %v711_v28 }
 0x2f8   : > { %v2685_v29 = vpop.permute.xlu0 %772 }
 0x2f9   : > { %v775_v30 = vmul.f32 %v2685_v29, %v2509_v8  ;;  %v776_v32 = vmul.f32 %v2685_v29, %v2514_v10 }
 0x30f   : > { %779 = vrot.lane.b32.xlu2 %v775_v30, %s2361_s18  ;;  %781 = vrot.lane.b32.xlu1 %v776_v32, %s2361_s18 }
 0x35f   : > { %v2693_v33 = vpop.f32.mrf.mxu3 }
 0x367   : > { %v819_v34 = vpop.f32.mrf.mxu3 }
 0x369   : > { %v716_v35 = vpop.xlane.xlu1 %715 }
 0x36a   : > { %v713_v1 = vpop.xlane.xlu2 %712  ;;  %v718_v37 = vsub.f32 %v710_v25, %v716_v35 }
 0x36b   : > { %v717_v4 = vsub.f32 %v709_v27, %v713_v1 }
 0x36c   : > { %v721_v40 = vmul.f32 1.442695, %v718_v37 }
 0x36d   : > { %v719_v5 = vmul.f32 1.442695, %v717_v4 }
 0x36f   : > { %2168 = vpow2.f32 %v719_v5  ;;  %v946_v39 = vpop.f32.mrf.mxu3 }
 0x370   : > { %2170 = vpow2.f32 %v721_v40  ;;  %v952_v45 = vmul.f32 0.1, %v946_v39  ;;  %v1326_v39 = vmul.f32 %v2598_v19, %v2645_v55 }
 0x372   : > { %v780_v41 = vpop.permute.xlu2 %779  ;;  %v954_v50 = vsub.f32 %v2641_v52, %v952_v45  ;;  %v2720_v52 = vpop.f32.mrf.mxu1 }
 0x373   : > { %v785_v8 = vsel %vm384_vm1, %v780_v41, 0.0 }
 0x374   : > { %786 = vadd.xlane.f32.xlu0 %v785_v8 }
 0x375   : > { %v2169_v10 = vpop.eup %2168 }
 0x376   : > { %v2698_v42 = vsel %vm642_vm11, %v2169_v10, 0.0  ;;  %v2171_v49 = vpop.eup %2170 }
 0x377   : > { %2007 = vmatmul.msk.f32.vlgmr.msra.gmra.mxu1 %vm435_vm4, %v2698_v42  ;;  %v949_v43 = vpop.f32.mrf.mxu3  ;;  %v2705_v54 = vsel %vm643_vm9, %v2171_v49, 0.0 }
 0x378   : > { %v953_v46 = vmul.f32 0.1, %v949_v43 }
 0x37a   : > { %v955_v47 = vsub.f32 %v366_v59, %v953_v46  ;;  %v2722_v58 = vpop.f32.mrf.mxu1  ;;  %v822_v59 = vperm.slane %v819_v34, 0 }
 0x37c   : > { %970 = vmatpush.msrb.mxu1 %v955_v47 }
 0x37e   : > { %971 = vmatpush.msrb.mxu1 %v954_v50 }
 0x37f   : > { %2008 = vmatmul.msk.f32.gmra.mxu1 %vm435_vm4, %v2705_v54 }
 0x380   : > { %2032 = vmatpush.xpose.msk.msra.mxu1 %vm384_vm1, %v2645_v55 }
 0x381   : > { %v782_v56 = vpop.permute.xlu1 %781 }
 0x382   : > { %v788_v57 = vsel %vm384_vm1, %v782_v56, 0.0  ;;  %v2724_v3 = vpop.f32.mrf.mxu1 }
 0x383   : > { %789 = vadd.xlane.f32.xlu2 %v788_v57  ;;  %v1325_v57 = vmul.f32 %v2598_v19, %v2637_v48  ;;  %v1076_v19 = vmul.f32 %v2532_v12, %v2637_v48 }
 0x384   : > { %2033 = vmatpush.xpose.msk.msra.mxu1 %vm384_vm1, %v2637_v48 }
 0x387   : > { %2020 = vmatmul.msk.f32.vlgmr.msrb.gmra.mxu1 %vm435_vm4, %v2664_v11 }
 0x38f   : > { %2021 = vmatmul.msk.f32.gmra.mxu1 %vm435_vm4, %v2673_v20 }
 0x397   : > { %2034 = vmatmul.msk.f32.vlgmr.msra.gmra.mxu1 %vm384_vm1, %v2489_v2 }
 0x3e7   : > { %v787_v61 = vpop.xlane.xlu0 %786 }
 0x3e8   : > { %v823_v63 = vadd.f32 %v822_v59, %v787_v61 }
 0x3ea   : > { %v827_v0 = vmul.f32 1.442695, %v823_v63  ;;  %vm825_vm13 = vcmp.gt.f32.partialorder %v823_v63, 0.0 }
 0x3ec   : > { %2172 = vpow2.f32 %v827_v0  ;;  %v1078_v0 = vsel %vm384_vm1, %v1076_v19, 0.0 }
 0x3f2   : > { %v2173_v9 = vpop.eup %2172 }
 0x3f3   : > { %v2012_v13 = vadd.f32 -1.0, %v2173_v9 }
 0x3f4   : > { %v2726_v14 = vpop.f32.mrf.mxu1 }
 0x3f5   : > { %v833_v18 = vsel %vm825_vm13, %v823_v63, %v2012_v13 }
 0x3f6   : > { %v790_v21 = vpop.xlane.xlu2 %789  ;;  %v835_v22 = vsel %vm642_vm11, %v833_v18, -1e+30 }
 0x3f7   : > { %v824_v31 = vadd.f32 %v822_v59, %v790_v21  ;;  %v837_v24 = vsel %vm435_vm4, %v835_v22, -inf  ;;  %v1081_v59 = vsel %vm384_vm1, %v1077_v16, 0.0 }
 0x3f8   : > { %838 = vmax.xlane.f32.xlu1 %v837_v24 }
 0x3f9   : > { %v829_v25 = vmul.f32 1.442695, %v824_v31  ;;  %vm826_vm14 = vcmp.gt.f32.partialorder %v824_v31, 0.0 }
 0x3fb   : > { %2174 = vpow2.f32 %v829_v25 }
 0x3fc   : > { %v2731_v26 = vpop.f32.mrf.mxu1 }
 0x401   : > { %v2175_v38 = vpop.eup %2174 }
 0x402   : > { %v2013_v27 = vadd.f32 -1.0, %v2175_v38 }
 0x404   : > { %v973_v28 = vpop.f32.mrf.mxu1  ;;  %v834_v30 = vsel %vm826_vm14, %v824_v31, %v2013_v27 }
 0x405   : > { %v836_v32 = vsel %vm643_vm9, %v834_v30, -1e+30  ;;  %v979_v1 = vmul.f32 0.1, %v973_v28 }
 0x406   : > { %v840_v34 = vsel %vm435_vm4, %v836_v32, -inf }
 0x407   : > { %841 = vmax.xlane.f32.xlu0 %v840_v34  ;;  %v2738_v5 = vsub.f32 %v954_v50, %v979_v1 }
 0x40c   : > { %v976_v35 = vpop.f32.mrf.mxu1 }
 0x40d   : > { %v980_v4 = vmul.f32 0.1, %v976_v35 }
 0x40f   : > { %v2736_v37 = vsub.f32 %v955_v47, %v980_v4 }
 0x411   : > { %997 = vmatpush.msrb.mxu2 %v2736_v37  ;;  %1196 = vrot.lane.b32.xlu1 %v2637_v48, %s2362_s19 }
 0x413   : > { %998 = vmatpush.msrb.mxu2 %v2738_v5 }
 0x419   : > { %1461 = vrot.lane.b32.xlu1 %v2645_v55, %s2361_s18 }
 0x421   : > { %1331 = vrot.lane.b32.xlu1 %v1326_v39, %s2363_s27 }
 0x46b   : > { %v839_v40 = vpop.xlane.xlu1 %838 }
 0x46c   : > { %v843_v41 = vsub.f32 %v835_v22, %v839_v40 }
 0x46e   : > { %v845_v8 = vmul.f32 1.442695, %v843_v41 }
 0x470   : > { %2176 = vpow2.f32 %v845_v8 }
 0x476   : > { %v2177_v10 = vpop.eup %2176 }
 0x477   : > { %v849_v43 = vsel %vm642_vm11, %v2177_v10, 0.0 }
 0x478   : > { %2014 = vmatmul.msk.f32.vlgmr.msra.gmra.mxu2 %vm435_vm4, %v849_v43  ;;  %v851_v45 = vsel %vm435_vm4, %v849_v43, 0.0 }
 0x479   : > { %1169 = vmatpush.msra.mxu2 %v2645_v55  ;;  %852 = vadd.xlane.f32.xlu2 %v851_v45 }
 0x47a   : > { %v842_v46 = vpop.xlane.xlu0 %841 }
 0x47b   : > { %1170 = vmatpush.msra.mxu2 %v2637_v48  ;;  %v844_v47 = vsub.f32 %v836_v32, %v842_v46 }
 0x47d   : > { %v847_v49 = vmul.f32 1.442695, %v844_v47 }
 0x47f   : > { %2178 = vpow2.f32 %v847_v49  ;;  %v2811_v49 = vld [vmem:[%s2552_s26 + $0x18] sm:$0xff] }
 0x480   : > { %vm1075_vm15 = vcmp.ne.f32.partialorder %v2811_v49, 0.0 }
 0x483   : > { %v1197_v61 = vpop.permute.xlu1 %1196 }
 0x485   : > { %v2179_v50 = vpop.eup %2178 }
 0x486   : > { %v850_v56 = vsel %vm643_vm9, %v2179_v50, 0.0 }
 0x487   : > { %2015 = vmatmul.msk.f32.gmra.mxu2 %vm435_vm4, %v850_v56  ;;  %v854_v62 = vsel %vm435_vm4, %v850_v56, 0.0 }
 0x488   : > { %855 = vadd.xlane.f32.xlu0 %v854_v62  ;;  %v2818_v62 = vld [vmem:[%s2552_s26 + $0x10] sm:$0xff] }
 0x489   : > { %vm1074_vm2 = vcmp.ne.f32.partialorder %v2818_v62, 0.0 }
 0x48b   : > { %v1462_v63 = vpop.permute.xlu1 %1461 }
 0x48f   : > { %2022 = vmatmul.msk.f32.vlgmr.msrb.gmra.mxu2 %vm435_vm4, %v2664_v11 }
 0x491   : > { %1343 = vrot.lane.b32.xlu2 %v2645_v55, %s2363_s27 }
 0x493   : > { %v1332_v9 = vpop.permute.xlu1 %1331 }
 0x494   : > { %v1338_v13 = vsel %vm384_vm1, %v1332_v9, 0.0 }
 0x497   : > { %2023 = vmatmul.msk.f32.gmra.mxu2 %vm435_vm4, %v2673_v20 }
 0x499   : > { %1329 = vrot.lane.b32.xlu2 %v1325_v57, %s2363_s27 }
 0x49c   : > { %1198 = vrot.lane.b32.xlu0 %v2645_v55, %s2362_s19 }
 0x4a4   : > { %1341 = vrot.lane.b32.xlu0 %v2637_v48, %s2363_s27 }
 0x4ac   : > { %1459 = vrot.lane.b32.xlu0 %v2637_v48, %s2361_s18 }
 0x4c2   : > { %1082 = vadd.xlane.f32.xlu2 %v1081_v59 }
 0x4d6   : > { %1079 = vadd.xlane.f32.xlu0 %v1078_v0 }
 0x4de   : > { %1339 = vadd.xlane.f32.xlu0 %v1338_v13 }
 0x4ec   : > { %v853_v18 = vpop.xlane.xlu2 %852 }
 0x4ed   : > { %v857_v38 = vmax.f32 %v853_v18, 1e-20 }
 0x4f4   : > { %v1344_v21 = vpop.permute.xlu2 %1343 }
 0x4f5   : > { %1430 = vmatpush.msrb.mxu2 %v1344_v21 }
 0x4fb   : > { %v856_v31 = vpop.xlane.xlu0 %855  ;;  %v886_v27 = vpop.f32.mrf.mxu2 }
 0x4fc   : > { %v1330_v22 = vpop.permute.xlu2 %1329  ;;  %v858_v25 = vmax.f32 %v856_v31, 1e-20 }
 0x4fd   : > { %v1335_v24 = vsel %vm384_vm1, %v1330_v22, 0.0  ;;  %v1180_v22 = vmul.f32 %v2507_v7, %v2637_v48 }
 0x4fe   : > { %1336 = vadd.xlane.f32.xlu1 %v1335_v24  ;;  %2180 = vrcp.f32 %v858_v25 }
 0x4ff   : > { %2182 = vrcp.f32 %v857_v38 }
 0x504   : > { %v2782_v12 = vpop.eup %2180 }
 0x505   : > { %v2785_v32 = vpop.eup %2182 }
 0x506   : > { %v892_v34 = vmul.f32 %v2785_v32, %v886_v27 }
 0x50a   : > { %v889_v28 = vpop.f32.mrf.mxu2 }
 0x50b   : > { %v893_v30 = vmul.f32 %v2782_v12, %v889_v28 }
 0x50d   : > { %908 = vmatpush.msra.mxu0 %v893_v30 }
 0x50e   : > { %v1199_v35 = vpop.permute.xlu0 %1198 }
 0x50f   : > { %909 = vmatpush.msra.mxu0 %v892_v34  ;;  %1285 = vmatpush.msrb.mxu1 %v1199_v35 }
 0x510   : > { %2016 = vmatmul.msk.f32.vlgmr.msra.gmra.mxu0 %vm435_vm4, %v849_v43 }
 0x511   : > { %1286 = vmatpush.msrb.mxu1 %v1197_v61 }
 0x512   : > { %v1000_v1 = vpop.f32.mrf.mxu2 }
 0x513   : > { %1548 = vmatpush.msra.mxu1 %v1462_v63  ;;  %v1006_v40 = vmul.f32 0.1, %v1000_v1 }
 0x515   : > { %v1008_v45 = vsub.f32 %v2738_v5, %v1006_v40 }
 0x516   : > { %v1342_v4 = vpop.permute.xlu0 %1341 }
 0x517   : > { %1431 = vmatpush.msrb.mxu2 %v1342_v4 }
 0x518   : > { %2017 = vmatmul.msk.f32.gmra.mxu0 %vm435_vm4, %v850_v56 }
 0x51a   : > { %v1003_v39 = vpop.f32.mrf.mxu2 }
 0x51b   : > { %v1007_v41 = vmul.f32 0.1, %v1003_v39 }
 0x51d   : > { %v1009_v8 = vsub.f32 %v2736_v37, %v1007_v41  ;;  %v1107_v37 = vpop.f32.mrf.mxu1 }
 0x51e   : > { %v1460_v10 = vpop.permute.xlu0 %1459  ;;  %v1110_v5 = vperm.slane %v1107_v37, 0 }
 0x51f   : > { %1024 = vmatpush.msrb.mxu0 %v1009_v8  ;;  %1549 = vmatpush.msra.mxu1 %v1460_v10 }
 0x521   : > { %1025 = vmatpush.msrb.mxu0 %v1008_v45 }
 0x522   : > { %2024 = vmatmul.msk.f32.vlgmr.msrb.gmra.mxu0 %vm435_vm4, %v2664_v11 }
 0x523   : > { %2039 = vmatpush.xpose.msk.msra.mxu0 %vm384_vm1, %v1199_v35 }
 0x527   : > { %2040 = vmatpush.xpose.msk.msra.mxu0 %vm384_vm1, %v1197_v61  ;;  %v2836_v61 = vld [vmem:[%s2469_s14 + $0x18] sm:$0xff] }
 0x528   : > { %v2840_v19 = vadd.f32 %v2836_v61, %v2811_v49  ;;  %vm1324_vm6 = vcmp.ne.f32.partialorder %v2836_v61, 0.0  ;;  %v453_v61 = vsel %vm435_vm4, %v2590_v17, 0.0 }
 0x52a   : > { %2025 = vmatmul.msk.f32.gmra.mxu0 %vm435_vm4, %v2673_v20 }
 0x52b   : > { %2048 = vmatpush.xpose.msk.msrb.mxu0 %vm384_vm1, %v1344_v21 }
 0x52f   : > { %2049 = vmatpush.xpose.msk.msrb.mxu0 %vm384_vm1, %v1342_v4 }
 0x532   : > { %2041 = vmatmul.msk.f32.vlgmr.msra.gmra.mxu0 %vm384_vm1, %v512_v23 }
 0x533   : > { %2055 = vmatpush.xpose.msk.msra.mxu0 %vm384_vm1, %v1462_v63 }
 0x535   : > { %v1083_v43 = vpop.xlane.xlu2 %1082 }
 0x536   : > { %v1112_v46 = vadd.f32 %v1110_v5, %v1083_v43 }
 0x537   : > { %2056 = vmatpush.xpose.msk.msra.mxu0 %vm384_vm1, %v1460_v10 }
 0x538   : > { %v1117_v47 = vmul.f32 1.442695, %v1112_v46  ;;  %vm1114_vm0 = vcmp.gt.f32.partialorder %v1112_v46, 0.0 }
 0x53a   : > { %2184 = vpow2.f32 %v1117_v47  ;;  %2050 = vmatmul.msk.f32.vlgmr.msrb.gmra.mxu0 %vm384_vm1, %v665_v36  ;;  %v2821_v36 = vld [vmem:[%s2469_s14 + $0x10] sm:$0xff] }
 0x53b   : > { %1608 = vmatpush.msrb.mxu0 %v2722_v58  ;;  %v2831_v59 = vadd.f32 %v2821_v36, %v2818_v62  ;;  %vm1323_vm5 = vcmp.ne.f32.partialorder %v2821_v36, 0.0  ;;  %v725_v36 = vsel %vm435_vm4, %v2698_v42, 0.0 }
 0x53d   : > { %1609 = vmatpush.msrb.mxu0 %v2720_v52 }
 0x540   : > { %v2185_v23 = vpop.eup %2184 }
 0x541   : > { %v2036_v50 = vadd.f32 -1.0, %v2185_v23 }
 0x542   : > { %2057 = vmatmul.msk.f32.vlgmr.msra.gmra.mxu0 %vm384_vm1, %v791_v60 }
 0x543   : > { %v1122_v56 = vsel %vm1114_vm0, %v1112_v46, %v2036_v50 }
 0x544   : > { %v2825_v57 = vsel %vm1075_vm15, %v1122_v56, -1e+30 }
 0x545   : > { %v1128_v16 = vsel %vm435_vm4, %v2825_v57, -inf }
 0x546   : > { %1129 = vmax.xlane.f32.xlu1 %v1128_v16 }
 0x549   : > { %v1080_v2 = vpop.xlane.xlu0 %1079 }
 0x54a   : > { %v1111_v60 = vadd.f32 %v1110_v5, %v1080_v2  ;;  %2064 = vmatmul.msk.f32.vlgmr.msrb.gmra.mxu0 %vm435_vm4, %v2831_v59 }
 0x54c   : > { %v1115_v63 = vmul.f32 1.442695, %v1111_v60  ;;  %vm1113_vm3 = vcmp.gt.f32.partialorder %v1111_v60, 0.0 }
 0x54e   : > { %2186 = vpow2.f32 %v1115_v63 }
 0x551   : > { %v1340_v39 = vpop.xlane.xlu0 %1339 }
 0x552   : > { %2065 = vmatmul.msk.f32.gmra.mxu0 %vm435_vm4, %v2840_v19 }
 0x554   : > { %v2187_v0 = vpop.eup %2186 }
 0x555   : > { %v2035_v9 = vadd.f32 -1.0, %v2187_v0 }
 0x557   : > { %v1121_v13 = vsel %vm1113_vm3, %v1111_v60, %v2035_v9 }
 0x558   : > { %v1123_v18 = vsel %vm1074_vm2, %v1121_v13, -1e+30 }
 0x559   : > { %v1125_v21 = vsel %vm435_vm4, %v1123_v18, -inf }
 0x55a   : > { %1126 = vmax.xlane.f32.xlu2 %v1125_v21 }
 0x55f   : > { %1184 = vrot.lane.b32.xlu1 %v1180_v22, %s2362_s19 }
 0x571   : > { %v1337_v40 = vpop.xlane.xlu1 %1336 }
 0x58d   : > { %v2851_v31 = vpop.f32.mrf.mxu0 }
 0x595   : > { %v2853_v24 = vpop.f32.mrf.mxu0 }
 0x59f   : > { %v1027_v25 = vpop.f32.mrf.mxu0 }
 0x5a0   : > { %v1033_v27 = vmul.f32 0.1, %v1027_v25 }
 0x5a2   : > { %v2857_v34 = vsub.f32 %v1008_v45, %v1033_v27 }
 0x5a7   : > { %v1030_v38 = vpop.f32.mrf.mxu0 }
 0x5a8   : > { %v1034_v28 = vmul.f32 0.1, %v1030_v38 }
 0x5aa   : > { %v2855_v30 = vsub.f32 %v1009_v8, %v1034_v28 }
 0x5ac   : > { %1051 = vmatpush.msrb.mxu3 %v2855_v30 }
 0x5ae   : > { %1052 = vmatpush.msrb.mxu3 %v2857_v34 }
 0x5af   : > { %2026 = vmatmul.msk.f32.vlgmr.msrb.gmra.mxu3 %vm435_vm4, %v2664_v11  ;;  %v2863_v35 = vpop.f32.mrf.mxu0 }
 0x5b7   : > { %2027 = vmatmul.msk.f32.gmra.mxu3 %vm435_vm4, %v2673_v20  ;;  %v1366_v1 = vpop.f32.mrf.mxu0 }
 0x5b8   : > { %v1369_v4 = vperm.slane %v1366_v1, 0 }
 0x5b9   : > { %v1130_v56 = vpop.xlane.xlu1 %1129 }
 0x5ba   : > { %v1370_v41 = vadd.f32 %v1369_v4, %v1337_v40  ;;  %v1371_v8 = vadd.f32 %v1369_v4, %v1340_v39  ;;  %v1132_v9 = vsub.f32 %v2825_v57, %v1130_v56  ;;  %v1181_v39 = vmul.f32 %v2507_v7, %v2645_v55 }
 0x5bb   : > { %v1444_v7 = vmul.f32 %v2685_v29, %v2645_v55 }
 0x5bc   : > { %v1374_v10 = vmul.f32 1.442695, %v1370_v41  ;;  %v1376_v45 = vmul.f32 1.442695, %v1371_v8  ;;  %vm1372_vm7 = vcmp.gt.f32.partialorder %v1370_v41, 0.0  ;;  %vm1373_vm8 = vcmp.gt.f32.partialorder %v1371_v8, 0.0 }
 0x5bd   : > { %v1135_v38 = vmul.f32 1.442695, %v1132_v9 }
 0x5be   : > { %2188 = vpow2.f32 %v1374_v10 }
 0x5bf   : > { %2190 = vpow2.f32 %v1376_v45  ;;  %v2867_v37 = vpop.f32.mrf.mxu0 }
 0x5c4   : > { %v2189_v5 = vpop.eup %2188 }
 0x5c5   : > { %v2191_v43 = vpop.eup %2190  ;;  %v2051_v11 = vadd.f32 -1.0, %v2189_v5 }
 0x5c6   : > { %v2052_v20 = vadd.f32 -1.0, %v2191_v43  ;;  %v1224_v43 = vperm.slane %v2863_v35, 0 }
 0x5c7   : > { %v1380_v46 = vsel %vm1372_vm7, %v1370_v41, %v2051_v11  ;;  %v1611_v47 = vpop.f32.mrf.mxu0 }
 0x5c8   : > { %v1381_v23 = vsel %vm1373_vm8, %v1371_v8, %v2052_v20  ;;  %v1382_v50 = vsel %vm1323_vm5, %v1380_v46, -1e+30  ;;  %v1617_v28 = vmul.f32 0.1, %v1611_v47 }
 0x5c9   : > { %v1383_v16 = vsel %vm1324_vm6, %v1381_v23, -1e+30  ;;  %v1384_v2 = vsel %vm435_vm4, %v1382_v50, -inf }
 0x5ca   : > { %v1387_v60 = vsel %vm435_vm4, %v1383_v16, -inf  ;;  %1385 = vmax.xlane.f32.xlu0 %v1384_v2  ;;  %v2889_v57 = vsub.f32 %v2720_v52, %v1617_v28 }
 0x5cb   : > { %1388 = vmax.xlane.f32.xlu2 %v1387_v60 }
 0x5cd   : > { %v1127_v63 = vpop.xlane.xlu2 %1126 }
 0x5ce   : > { %v1131_v0 = vsub.f32 %v1123_v18, %v1127_v63 }
 0x5cf   : > { %v1614_v22 = vpop.f32.mrf.mxu0 }
 0x5d0   : > { %v1133_v13 = vmul.f32 1.442695, %v1131_v0  ;;  %v1618_v27 = vmul.f32 0.1, %v1614_v22  ;;  %v1487_v22 = vperm.slane %v2867_v37, 0 }
 0x5d1   : > { %v1185_v21 = vpop.permute.xlu1 %1184 }
 0x5d2   : > { %2192 = vpow2.f32 %v1133_v13  ;;  %v1190_v25 = vsel %vm384_vm1, %v1185_v21, 0.0  ;;  %v2880_v4 = vsub.f32 %v2722_v58, %v1618_v27  ;;  %v1443_v58 = vmul.f32 %v2685_v29, %v2637_v48 }
 0x5d3   : > { %1191 = vadd.xlane.f32.xlu1 %v1190_v25  ;;  %2194 = vpow2.f32 %v1135_v38 }
 0x5d8   : > { %v2193_v1 = vpop.eup %2192 }
 0x5d9   : > { %v2884_v18 = vsel %vm1074_vm2, %v2193_v1, 0.0  ;;  %v2195_v40 = vpop.eup %2194 }
 0x5da   : > { %2037 = vmatmul.msk.f32.vlgmr.msra.gmra.mxu2 %vm435_vm4, %v2884_v18  ;;  %v2900_v41 = vsel %vm1075_vm15, %v2195_v40, 0.0 }
 0x5db   : > { %1635 = vmatpush.msra.mxu2 %v2880_v4 }
 0x5dd   : > { %1636 = vmatpush.msra.mxu2 %v2889_v57 }
 0x5de   : > { %1186 = vrot.lane.b32.xlu0 %v1181_v39, %s2362_s19 }
 0x5e2   : > { %2038 = vmatmul.msk.f32.gmra.mxu2 %vm435_vm4, %v2900_v41 }
 0x5e3   : > { %1447 = vrot.lane.b32.xlu2 %v1443_v58, %s2361_s18 }
 0x5e6   : > { %1449 = vrot.lane.b32.xlu0 %v1444_v7, %s2361_s18 }
 0x63d   : > { %v1386_v52 = vpop.xlane.xlu0 %1385 }
 0x63e   : > { %v1390_v8 = vsub.f32 %v1382_v50, %v1386_v52  ;;  %v1389_v10 = vpop.xlane.xlu2 %1388 }
 0x63f   : > { %v1391_v5 = vsub.f32 %v1383_v16, %v1389_v10 }
 0x640   : > { %v1392_v45 = vmul.f32 1.442695, %v1390_v8 }
 0x641   : > { %v1394_v48 = vmul.f32 1.442695, %v1391_v5 }
 0x642   : > { %2196 = vpow2.f32 %v1392_v45 }
 0x643   : > { %2198 = vpow2.f32 %v1394_v48 }
 0x646   : > { %v1192_v11 = vpop.xlane.xlu1 %1191  ;;  %v1448_v20 = vpop.permute.xlu2 %1447 }
 0x647   : > { %v1225_v46 = vadd.f32 %v1224_v43, %v1192_v11  ;;  %v1453_v47 = vsel %vm384_vm1, %v1448_v20, 0.0 }
 0x648   : > { %v2197_v23 = vpop.eup %2196  ;;  %1454 = vadd.xlane.f32.xlu0 %v1453_v47 }
 0x649   : > { %v1229_v55 = vmul.f32 1.442695, %v1225_v46  ;;  %v2912_v29 = vsel %vm1323_vm5, %v2197_v23, 0.0  ;;  %v2199_v50 = vpop.eup %2198  ;;  %vm1227_vm9 = vcmp.gt.f32.partialorder %v1225_v46, 0.0 }
 0x64a   : > { %2053 = vmatmul.msk.f32.vlgmr.msrb.gmra.mxu2 %vm435_vm4, %v2912_v29  ;;  %v2919_v2 = vsel %vm1324_vm6, %v2199_v50, 0.0 }
 0x64b   : > { %2200 = vpow2.f32 %v1229_v55  ;;  %v1401_v42 = vsel %vm435_vm4, %v2919_v2, 0.0 }
 0x650   : > { %v1187_v56 = vpop.permute.xlu0 %1186 }
 0x651   : > { %v2201_v35 = vpop.eup %2200  ;;  %v1193_v16 = vsel %vm384_vm1, %v1187_v56, 0.0 }
 0x652   : > { %1194 = vadd.xlane.f32.xlu2 %v1193_v16  ;;  %2054 = vmatmul.msk.f32.gmra.mxu2 %vm435_vm4, %v2919_v2  ;;  %v2042_v60 = vadd.f32 -1.0, %v2201_v35 }
 0x654   : > { %v1235_v63 = vsel %vm1227_vm9, %v1225_v46, %v2042_v60 }
 0x655   : > { %v1237_v0 = vsel %vm1074_vm2, %v1235_v63, -1e+30 }
 0x656   : > { %v1239_v9 = vsel %vm435_vm4, %v1237_v0, -inf }
 0x657   : > { %1240 = vmax.xlane.f32.xlu1 %v1239_v9 }
 0x658   : > { %v1450_v13 = vpop.permute.xlu0 %1449 }
 0x659   : > { %v1456_v21 = vsel %vm384_vm1, %v1450_v13, 0.0 }
 0x65a   : > { %1457 = vadd.xlane.f32.xlu2 %v1456_v21  ;;  %2066 = vmatmul.msk.f32.vlgmr.msra.gmra.mxu2 %vm435_vm4, %v2831_v59 }
 0x65d   : > { %v2932_v25 = vpop.f32.mrf.mxu2 }
 0x662   : > { %2067 = vmatmul.msk.f32.gmra.mxu2 %vm435_vm4, %v2840_v19 }
 0x665   : > { %v2934_v1 = vpop.f32.mrf.mxu2 }
 0x6bb   : > { %v1455_v38 = vpop.xlane.xlu0 %1454 }
 0x6bc   : > { %v1488_v27 = vadd.f32 %v1487_v22, %v1455_v38  ;;  %v450_v38 = vsel %vm435_vm4, %v2582_v15, 0.0  ;;  %v1142_v15 = vsel %vm435_vm4, %v2900_v41, 0.0 }
 0x6be   : > { %v1492_v28 = vmul.f32 1.442695, %v1488_v27  ;;  %vm1490_vm10 = vcmp.gt.f32.partialorder %v1488_v27, 0.0 }
 0x6c0   : > { %2202 = vpow2.f32 %v1492_v28 }
 0x6c5   : > { %v1195_v39 = vpop.xlane.xlu2 %1194 }
 0x6c6   : > { %v2203_v40 = vpop.eup %2202  ;;  %v1226_v58 = vadd.f32 %v1224_v43, %v1195_v39 }
 0x6c7   : > { %v2058_v7 = vadd.f32 -1.0, %v2203_v40  ;;  %v728_v40 = vsel %vm435_vm4, %v2705_v54, 0.0 }
 0x6c8   : > { %v1231_v52 = vmul.f32 1.442695, %v1226_v58  ;;  %vm1228_vm11 = vcmp.gt.f32.partialorder %v1226_v58, 0.0 }
 0x6c9   : > { %v1498_v8 = vsel %vm1490_vm10, %v1488_v27, %v2058_v7 }
 0x6ca   : > { %2204 = vpow2.f32 %v1231_v52  ;;  %v1241_v10 = vpop.xlane.xlu1 %1240  ;;  %v1500_v37 = vsel %vm1323_vm5, %v1498_v8, -1e+30 }
 0x6cb   : > { %v1245_v45 = vsub.f32 %v1237_v0, %v1241_v10  ;;  %v1502_v5 = vsel %vm435_vm4, %v1500_v37, -inf }
 0x6cc   : > { %1503 = vmax.xlane.f32.xlu2 %v1502_v5 }
 0x6cd   : > { %v1247_v48 = vmul.f32 1.442695, %v1245_v45  ;;  %v2939_v11 = vpop.f32.mrf.mxu2  ;;  %v1458_v20 = vpop.xlane.xlu2 %1457 }
 0x6ce   : > { %v1489_v46 = vadd.f32 %v1487_v22, %v1458_v20 }
 0x6cf   : > { %2206 = vpow2.f32 %v1247_v48 }
 0x6d0   : > { %v2205_v43 = vpop.eup %2204  ;;  %v1494_v47 = vmul.f32 1.442695, %v1489_v46  ;;  %vm1491_vm12 = vcmp.gt.f32.partialorder %v1489_v46, 0.0 }
 0x6d1   : > { %v2043_v23 = vadd.f32 -1.0, %v2205_v43 }
 0x6d2   : > { %2208 = vpow2.f32 %v1494_v47 }
 0x6d3   : > { %v1236_v55 = vsel %vm1228_vm11, %v1226_v58, %v2043_v23 }
 0x6d4   : > { %v1238_v50 = vsel %vm1075_vm15, %v1236_v55, -1e+30 }
 0x6d5   : > { %v2207_v56 = vpop.eup %2206  ;;  %v2943_v35 = vpop.f32.mrf.mxu2  ;;  %v1242_v16 = vsel %vm435_vm4, %v1238_v50, -inf }
 0x6d6   : > { %v2948_v60 = vsel %vm1074_vm2, %v2207_v56, 0.0  ;;  %1243 = vmax.xlane.f32.xlu0 %v1242_v16  ;;  %v1398_v56 = vsel %vm435_vm4, %v2912_v29, 0.0  ;;  %v296_v29 = vld [vmem:[#allocation4 + $0x30] sm:$0xff] }
 0x6d7   : > { %2044 = vmatmul.msk.f32.vlgmr.msrb.gmra.mxu1 %vm435_vm4, %v2948_v60  ;;  %v1253_v63 = vsel %vm435_vm4, %v2948_v60, 0.0 }
 0x6d8   : > { %v2209_v0 = vpop.eup %2208  ;;  %1254 = vadd.xlane.f32.xlu2 %v1253_v63  ;;  %v298_v63 = vld [vmem:[#allocation4 + $0x50] sm:$0xff] }
 0x6d9   : > { %v2059_v9 = vadd.f32 -1.0, %v2209_v0  ;;  %1757 = vmatpush.msrb.mxu2 %v298_v63 }
 0x6db   : > { %v1499_v13 = vsel %vm1491_vm12, %v1489_v46, %v2059_v9  ;;  %v297_v9 = vld [vmem:[#allocation4 + $0x40] sm:$0xff] }
 0x6dc   : > { %v1501_v21 = vsel %vm1324_vm6, %v1499_v13, -1e+30  ;;  %1758 = vmatpush.msrb.mxu2 %v297_v9 }
 0x6dd   : > { %v1638_v22 = vpop.f32.mrf.mxu2  ;;  %v1505_v62 = vsel %vm435_vm4, %v1501_v21, -inf }
 0x6de   : > { %1506 = vmax.xlane.f32.xlu1 %v1505_v62  ;;  %v1644_v28 = vmul.f32 0.1, %v1638_v22  ;;  %1759 = vmatpush.msrb.mxu2 %v296_v29  ;;  %v295_v22 = vld [vmem:[#allocation4 + $0x20] sm:$0xff] }
 0x6e0   : > { %451 = vadd.xlane.f32.xlu2 %v450_v38  ;;  %v2965_v7 = vsub.f32 %v2889_v57, %v1644_v28  ;;  %1760 = vmatpush.msrb.mxu2 %v295_v22 }
 0x6e5   : > { %v1641_v27 = vpop.f32.mrf.mxu2 }
 0x6e6   : > { %v1645_v39 = vmul.f32 0.1, %v1641_v27 }
 0x6e8   : > { %v2962_v58 = vsub.f32 %v2880_v4, %v1645_v39  ;;  %729 = vadd.xlane.f32.xlu2 %v728_v40 }
 0x6ea   : > { %1662 = vmatpush.msrb.mxu1 %v2962_v58 }
 0x6ec   : > { %1663 = vmatpush.msrb.mxu1 %v2965_v7 }
 0x6f0   : > { %1143 = vadd.xlane.f32.xlu2 %v1142_v15 }
 0x73f   : > { %v1504_v52 = vpop.xlane.xlu2 %1503 }
 0x740   : > { %v1508_v10 = vsub.f32 %v1500_v37, %v1504_v52 }
 0x742   : > { %v1510_v5 = vmul.f32 1.442695, %v1508_v10 }
 0x749   : > { %v1244_v8 = vpop.xlane.xlu0 %1243 }
 0x74a   : > { %v1246_v45 = vsub.f32 %v1238_v50, %v1244_v8  ;;  %v1139_v50 = vsel %vm435_vm4, %v2884_v18, 0.0 }
 0x74b   : > { %v1255_v17 = vpop.xlane.xlu2 %1254 }
 0x74c   : > { %v1249_v54 = vmul.f32 1.442695, %v1246_v45  ;;  %v1259_v16 = vmax.f32 %v1255_v17, 1e-20 }
 0x74e   : > { %2210 = vpow2.f32 %v1249_v54 }
 0x74f   : > { %2212 = vpow2.f32 %v1510_v5 }
 0x751   : > { %v1507_v4 = vpop.xlane.xlu1 %1506 }
 0x752   : > { %v1509_v48 = vsub.f32 %v1501_v21, %v1507_v4 }
 0x753   : > { %v452_v0 = vpop.xlane.xlu2 %451 }
 0x754   : > { %v2211_v57 = vpop.eup %2210  ;;  %v1512_v20 = vmul.f32 1.442695, %v1509_v48  ;;  %v1288_v18 = vpop.f32.mrf.mxu1  ;;  %v456_v28 = vmax.f32 %v452_v0, 1e-20 }
 0x755   : > { %v2973_v46 = vsel %vm1075_vm15, %v2211_v57, 0.0  ;;  %v2213_v37 = vpop.eup %2212 }
 0x756   : > { %2214 = vpow2.f32 %v1512_v20  ;;  %2045 = vmatmul.msk.f32.gmra.mxu1 %vm435_vm4, %v2973_v46  ;;  %v1256_v41 = vsel %vm435_vm4, %v2973_v46, 0.0  ;;  %v2981_v43 = vsel %vm1323_vm5, %v2213_v37, 0.0 }
 0x757   : > { %1257 = vadd.xlane.f32.xlu0 %v1256_v41  ;;  %v1516_v55 = vsel %vm435_vm4, %v2981_v43, 0.0  ;;  %2216 = vrcp.f32 %v1259_v16  ;;  %v1054_v41 = vpop.f32.mrf.mxu3 }
 0x75b   : > { %v730_v39 = vpop.xlane.xlu2 %729 }
 0x75c   : > { %v2215_v47 = vpop.eup %2214  ;;  %v732_v8 = vmax.f32 %v730_v39, 1e-20 }
 0x75d   : > { %v2985_v23 = vsel %vm1324_vm6, %v2215_v47, 0.0  ;;  %v3009_v62 = vpop.eup %2216 }
 0x75e   : > { %2060 = vmatmul.msk.f32.vlgmr.msra.gmra.mxu1 %vm435_vm4, %v2981_v43  ;;  %v1519_v49 = vsel %vm435_vm4, %v2985_v23, 0.0  ;;  %v1294_v52 = vmul.f32 %v3009_v62, %v1288_v18 }
 0x75f   : > { %1520 = vadd.xlane.f32.xlu1 %v1519_v49  ;;  %1517 = vadd.xlane.f32.xlu0 %v1516_v55  ;;  %v638_v55 = vmul.f32 %v2643_v53, %v2724_v3  ;;  %v1057_v3 = vpop.f32.mrf.mxu3 }
 0x766   : > { %2061 = vmatmul.msk.f32.gmra.mxu1 %vm435_vm4, %v2985_v23 }
 0x767   : > { %726 = vadd.xlane.f32.xlu1 %v725_v36  ;;  %454 = vadd.xlane.f32.xlu0 %v453_v61 }
 0x76e   : > { %2068 = vmatmul.msk.f32.vlgmr.msrb.gmra.mxu1 %vm435_vm4, %v2831_v59 }
 0x76f   : > { %1140 = vadd.xlane.f32.xlu1 %v1139_v50  ;;  %1399 = vadd.xlane.f32.xlu0 %v1398_v56  ;;  %v1060_v56 = vmul.f32 0.1, %v1054_v41 }
 0x776   : > { %2069 = vmatmul.msk.f32.gmra.mxu1 %vm435_vm4, %v2840_v19 }
 0x777   : > { %1402 = vadd.xlane.f32.xlu1 %v1401_v42 }
 0x7ca   : > { %v1258_v13 = vpop.xlane.xlu0 %1257 }
 0x7cb   : > { %v1260_v21 = vmax.f32 %v1258_v13, 1e-20 }
 0x7cd   : > { %2218 = vrcp.f32 %v1260_v21 }
 0x7ce   : > { %2220 = vrcp.f32 %v456_v28 }
 0x7cf   : > { %2222 = vrcp.f32 %v732_v8 }
 0x7d2   : > { %v1521_v2 = vpop.xlane.xlu1 %1520  ;;  %v1518_v38 = vpop.xlane.xlu0 %1517 }
 0x7d3   : > { %v3011_v27 = vpop.eup %2218  ;;  %v1291_v40 = vpop.f32.mrf.mxu1  ;;  %v1523_v10 = vmax.f32 %v1521_v2, 1e-20  ;;  %v1522_v45 = vmax.f32 %v1518_v38, 1e-20 }
 0x7d4   : > { %v1295_v15 = vmul.f32 %v3011_v27, %v1291_v40  ;;  %v2221_v20 = vpop.eup %2220  ;;  %v1144_v40 = vpop.xlane.xlu2 %1143 }
 0x7d5   : > { %2224 = vrcp.f32 %v1523_v10  ;;  %v2223_v37 = vpop.eup %2222  ;;  %v489_v47 = vmul.f32 %v2221_v20, %v2633_v6  ;;  %v639_v6 = vmul.f32 %v2639_v51, %v2693_v33  ;;  %v918_v51 = vmul.f32 %v2782_v12, %v2853_v24 }
 0x7d6   : > { %1310 = vmatpush.msra.mxu3 %v1295_v15  ;;  %2226 = vrcp.f32 %v1522_v45  ;;  %v767_v9 = vmul.f32 %v2223_v37, %v2731_v26  ;;  %v1061_v33 = vmul.f32 0.1, %v1057_v3  ;;  %v1146_v15 = vmax.f32 %v1144_v40, 1e-20 }
 0x7d7   : > { %v640_v42 = vadd.f32 %v638_v55, %v489_v47 }
 0x7d8   : > { %1311 = vmatpush.msra.mxu3 %v1294_v52  ;;  %v1063_v22 = vsub.f32 %v2855_v30, %v1061_v33 }
 0x7d9   : > { %2046 = vmatmul.msk.f32.vlgmr.msra.gmra.mxu3 %vm435_vm4, %v2948_v60 }
 0x7da   : > { %v727_v54 = vpop.xlane.xlu1 %726  ;;  %v455_v5 = vpop.xlane.xlu0 %454 }
 0x7db   : > { %v731_v4 = vmax.f32 %v727_v54, 1e-20  ;;  %v457_v48 = vmax.f32 %v455_v5, 1e-20  ;;  %v1551_v57 = vpop.f32.mrf.mxu1  ;;  %v3018_v49 = vpop.eup %2224 }
 0x7dc   : > { %v3022_v60 = vpop.eup %2226 }
 0x7dd   : > { %2228 = vrcp.f32 %v731_v4  ;;  %v1557_v53 = vmul.f32 %v3022_v60, %v1551_v57 }
 0x7de   : > { %2230 = vrcp.f32 %v457_v48 }
 0x7e1   : > { %2047 = vmatmul.msk.f32.gmra.mxu3 %vm435_vm4, %v2973_v46  ;;  %v917_v46 = vmul.f32 %v2785_v32, %v2851_v31 }
 0x7e2   : > { %v1141_v30 = vpop.xlane.xlu1 %1140  ;;  %v1400_v28 = vpop.xlane.xlu0 %1399 }
 0x7e3   : > { %v2229_v36 = vpop.eup %2228  ;;  %v1554_v61 = vpop.f32.mrf.mxu1  ;;  %v1404_v39 = vmax.f32 %v1400_v28, 1e-20 }
 0x7e4   : > { %v2231_v50 = vpop.eup %2230  ;;  %v766_v17 = vmul.f32 %v2229_v36, %v2726_v14  ;;  %v1558_v16 = vmul.f32 %v3018_v49, %v1554_v61  ;;  %v1062_v14 = vsub.f32 %v2857_v34, %v1060_v56 }
 0x7e5   : > { %v490_v63 = vmul.f32 %v2231_v50, %v2635_v44 }
 0x7e6   : > { %v768_v0 = vadd.f32 %v766_v17, %v640_v42  ;;  %1573 = vmatpush.msrb.mxu3 %v1558_v16 }
 0x7e7   : > { %v641_v13 = vadd.f32 %v639_v6, %v490_v63 }
 0x7e8   : > { %v919_v18 = vadd.f32 %v917_v46, %v768_v0  ;;  %1574 = vmatpush.msrb.mxu3 %v1557_v53 }
 0x7e9   : > { %2062 = vmatmul.msk.f32.vlgmr.msrb.gmra.mxu3 %vm435_vm4, %v2981_v43  ;;  %v769_v44 = vadd.f32 %v767_v9, %v641_v13 }
 0x7ea   : > { %v1064_v32 = vadd.f32 %v1062_v14, %v919_v18 }
 0x7eb   : > { %v1665_v31 = vpop.f32.mrf.mxu1  ;;  %v920_v21 = vadd.f32 %v918_v51, %v769_v44 }
 0x7ec   : > { %v1066_v29 = vmax.f32 %v1064_v32, 0.0  ;;  %v1671_v2 = vmul.f32 0.1, %v1665_v31 }
 0x7ed   : > { %v1065_v26 = vadd.f32 %v1063_v22, %v920_v21 }
 0x7ee   : > { %2074 = vmatmul.msk.f32.vlgmr.msrb.gmra.mxu2 %vm384_vm1, %v1066_v29  ;;  %v3049_v38 = vsub.f32 %v2965_v7, %v1671_v2  ;;  %v1403_v7 = vpop.xlane.xlu1 %1402 }
 0x7ef   : > { %v1067_v24 = vmax.f32 %v1065_v26, 0.0  ;;  %v1405_v45 = vmax.f32 %v1403_v7, 1e-20 }
 0x7f1   : > { %2063 = vmatmul.msk.f32.gmra.mxu3 %vm435_vm4, %v2985_v23  ;;  %v1145_v23 = vmax.f32 %v1141_v30, 1e-20 }
 0x7f3   : > { %v1668_v34 = vpop.f32.mrf.mxu1  ;;  %2232 = vrcp.f32 %v1145_v23 }
 0x7f4   : > { %v1672_v12 = vmul.f32 0.1, %v1668_v34  ;;  %2234 = vrcp.f32 %v1404_v39 }
 0x7f5   : > { %2236 = vrcp.f32 %v1146_v15 }
 0x7f6   : > { %v3045_v43 = vsub.f32 %v2962_v58, %v1672_v12  ;;  %2075 = vmatmul.msk.f32.gmra.mxu2 %vm384_vm1, %v1067_v24  ;;  %2238 = vrcp.f32 %v1405_v45 }
 0x7f8   : > { %1689 = vmatpush.msra.mxu3 %v3045_v43 }
 0x7f9   : > { %v2233_v52 = vpop.eup %2232 }
 0x7fa   : > { %1690 = vmatpush.msra.mxu3 %v3049_v38  ;;  %v1178_v54 = vmul.f32 %v2233_v52, %v2932_v25  ;;  %v2235_v5 = vpop.eup %2234 }
 0x7fb   : > { %2070 = vmatmul.msk.f32.vlgmr.msra.gmra.mxu3 %vm435_vm4, %v2831_v59  ;;  %v1439_v48 = vmul.f32 %v2235_v5, %v2939_v11  ;;  %v2237_v57 = vpop.eup %2236 }
 0x7fc   : > { %v1179_v55 = vmul.f32 %v2237_v57, %v2934_v1  ;;  %v2239_v61 = vpop.eup %2238 }
 0x7fd   : > { %v1440_v11 = vmul.f32 %v2239_v61, %v2943_v35 }
 0x803   : > { %2071 = vmatmul.msk.f32.gmra.mxu3 %vm435_vm4, %v2840_v19 }
 0x85c   : > { %v1313_v58 = vpop.f32.mrf.mxu3 }
 0x85d   : > { %v1319_v10 = vmul.f32 %v3009_v62, %v1313_v58  ;;  %v3065_v62 = vld [vmem:[#allocation4 + $0x60] ss:$0 sm:$0xff] }
 0x85f   : > { %v1321_v4 = vadd.f32 %v1319_v10, %v1178_v54 }
 0x861   : > { %v1441_v37 = vadd.f32 %v1439_v48, %v1321_v4 }
 0x864   : > { %v1316_v8 = vpop.f32.mrf.mxu3 }
 0x865   : > { %v1320_v41 = vmul.f32 %v3011_v27, %v1316_v8 }
 0x867   : > { %v1322_v25 = vadd.f32 %v1320_v41, %v1179_v55 }
 0x869   : > { %v1442_v16 = vadd.f32 %v1440_v11, %v1322_v25 }
 0x86c   : > { %v1576_v20 = vpop.f32.mrf.mxu3 }
 0x86d   : > { %v1582_v47 = vmul.f32 %v3022_v60, %v1576_v20 }
 0x86f   : > { %v3063_v36 = vadd.f32 %v1582_v47, %v1441_v37 }
 0x871   : > { %v1762_v50 = vpop.f32.mrf.mxu2 }
 0x872   : > { %v1763_v56 = vadd.f32 %v1762_v50, %v3065_v62 }
 0x874   : > { %v1774_v42 = vsub.f32 0.0, %v1763_v56  ;;  %v1579_v17 = vpop.f32.mrf.mxu3 }
 0x875   : > { %v1583_v27 = vmul.f32 %v3018_v49, %v1579_v17 }
 0x876   : > { %v1778_v6 = vmul.f32 1.442695, %v1774_v42 }
 0x877   : > { %v3070_v60 = vadd.f32 %v1583_v27, %v1442_v16 }
 0x878   : > { %2240 = vpow2.f32 %v1778_v6 }
 0x879   : > { %v1765_v1 = vpop.f32.mrf.mxu2 }
 0x87a   : > { %v1766_v63 = vadd.f32 %v1765_v1, %v3065_v62 }
 0x87c   : > { %v1775_v46 = vsub.f32 0.0, %v1766_v63 }
 0x87e   : > { %v2241_v0 = vpop.eup %2240  ;;  %v1780_v53 = vmul.f32 1.442695, %v1775_v46  ;;  %v1692_v3 = vpop.f32.mrf.mxu3 }
 0x87f   : > { %v1786_v9 = vadd.f32 1.0, %v2241_v0  ;;  %v1698_v44 = vmul.f32 0.1, %v1692_v3 }
 0x880   : > { %2242 = vpow2.f32 %v1780_v53 }
 0x881   : > { %2244 = vrcp.f32 %v1786_v9  ;;  %v1801_v31 = vand.u32 2147483648, %v1786_v9  ;;  %v1799_v29 = vand.u32 2147483647, %v1786_v9  ;;  %v1700_v22 = vsub.f32 %v3049_v38, %v1698_v44 }
 0x882   : > { %vm1795_vm14 = vweird.f32 %v1786_v9 }
 0x883   : > { %v1802_v2 = vor.u32 1.1754944e-38, %v1801_v31  ;;  %vm1800_vm0 = vcmp.eq.f32.partialorder %v1799_v29, 8.507059e+37 }
 0x886   : > { %v2243_v35 = vpop.eup %2242  ;;  %v1695_v13 = vpop.f32.mrf.mxu3 }
 0x887   : > { %v2245_v14 = vpop.eup %2244  ;;  %v1787_v18 = vadd.f32 1.0, %v2243_v35  ;;  %v1699_v51 = vmul.f32 0.1, %v1695_v13 }
 0x888   : > { %v1791_v49 = vmul.f32 %v2245_v14, %v1786_v9  ;;  %vm1796_vm13 = vweird.f32 %v2245_v14 }
 0x889   : > { %2246 = vrcp.f32 %v1787_v18  ;;  %v1701_v32 = vsub.f32 %v3045_v43, %v1699_v51  ;;  %vm1797_vm15 = vmor %vm1795_vm14, %vm1796_vm13  ;;  %v1816_v30 = vand.u32 2147483648, %v1787_v18  ;;  %v1814_v28 = vand.u32 2147483647, %v1787_v18 }
 0x88a   : > { %v1792_v33 = vsub.f32 1.0, %v1791_v49  ;;  %vm1810_vm3 = vweird.f32 %v1787_v18 }
 0x88b   : > { %1716 = vmatpush.msra.mxu0 %v1701_v32  ;;  %v1817_v39 = vor.u32 1.1754944e-38, %v1816_v30  ;;  %vm1815_vm6 = vcmp.eq.f32.partialorder %v1814_v28, 8.507059e+37 }
 0x88c   : > { %v1793_v21 = vmul.f32 %v2245_v14, %v1792_v33 }
 0x88d   : > { %1717 = vmatpush.msra.mxu0 %v1700_v22 }
 0x88e   : > { %v1794_v26 = vadd.f32 %v2245_v14, %v1793_v21  ;;  %2072 = vmatmul.msk.f32.vlgmr.msra.gmra.mxu0 %vm435_vm4, %v2831_v59 }
 0x88f   : > { %v2247_v34 = vpop.eup %2246 }
 0x890   : > { %v1798_v12 = vsel %vm1797_vm15, %v2245_v14, %v1794_v26  ;;  %v1806_v24 = vmul.f32 %v2247_v34, %v1787_v18  ;;  %vm1811_vm2 = vweird.f32 %v2247_v34 }
 0x891   : > { %v1803_v43 = vsel %vm1800_vm0, %v1802_v2, %v1798_v12  ;;  %vm1812_vm5 = vmor %vm1810_vm3, %vm1811_vm2 }
 0x892   : > { %1850 = vst [vmem:[%s3079_s5] sm:$0xff] %v1803_v43  ;;  %v1807_v38 = vsub.f32 1.0, %v1806_v24 }
 0x894   : > { %v1808_v23 = vmul.f32 %v2247_v34, %v1807_v38 }
 0x896   : > { %v1809_v58 = vadd.f32 %v2247_v34, %v1808_v23  ;;  %2073 = vmatmul.msk.f32.gmra.mxu0 %vm435_vm4, %v2840_v19 }
 0x898   : > { %v1813_v40 = vsel %vm1812_vm5, %v2247_v34, %v1809_v58 }
 0x899   : > { %v1818_v59 = vsel %vm1815_vm6, %v1817_v39, %v1813_v40 }
 0x89a   : > { %1851 = vst [vmem:[%s3079_s5 + $0x8] sm:$0xff] %v1818_v59 }
 0x90b   : > { %v1719_v15 = vpop.f32.mrf.mxu0 }
 0x90c   : > { %v1725_v7 = vmul.f32 0.1, %v1719_v15 }
 0x90e   : > { %v1727_v52 = vsub.f32 %v1700_v22, %v1725_v7 }
 0x910   : > { %v1729_v8 = vadd.f32 %v1727_v52, %v3063_v36 }
 0x912   : > { %v1731_v10 = vmax.f32 %v1729_v8, 0.0 }
 0x913   : > { %v1722_v45 = vpop.f32.mrf.mxu0 }
 0x914   : > { %v1726_v54 = vmul.f32 0.1, %v1722_v45  ;;  %2076 = vmatmul.msk.f32.gmra.mxu2 %vm384_vm1, %v1731_v10 }
 0x916   : > { %v1728_v5 = vsub.f32 %v1701_v32, %v1726_v54 }
 0x918   : > { %v1730_v4 = vadd.f32 %v1728_v5, %v3070_v60 }
 0x91a   : > { %v1732_v48 = vmax.f32 %v1730_v4, 0.0 }
 0x91c   : > { %2077 = vmatmul.msk.f32.gmra.mxu2 %vm384_vm1, %v1732_v48 }
 0x997   : > { %v1768_v19 = vpop.f32.mrf.mxu2 }
 0x998   : > { %v1769_v57 = vadd.f32 %v1768_v19, %v3065_v62 }
 0x99a   : > { %v1776_v20 = vsub.f32 0.0, %v1769_v57 }
 0x99c   : > { %v1782_v41 = vmul.f32 1.442695, %v1776_v20 }
 0x99e   : > { %2248 = vpow2.f32 %v1782_v41 }
 0x99f   : > { %v1771_v37 = vpop.f32.mrf.mxu2 }
 0x9a0   : > { %v1772_v47 = vadd.f32 %v1771_v37, %v3065_v62 }
 0x9a2   : > { %v1777_v55 = vsub.f32 0.0, %v1772_v47 }
 0x9a4   : > { %v2249_v36 = vpop.eup %2248  ;;  %v1784_v61 = vmul.f32 1.442695, %v1777_v55 }
 0x9a5   : > { %v1788_v25 = vadd.f32 1.0, %v2249_v36 }
 0x9a6   : > { %2250 = vpow2.f32 %v1784_v61 }
 0x9a7   : > { %2252 = vrcp.f32 %v1788_v25  ;;  %v1831_v16 = vand.u32 2147483648, %v1788_v25  ;;  %v1829_v6 = vand.u32 2147483647, %v1788_v25  ;;  %vm1825_vm4 = vweird.f32 %v1788_v25 }
 0x9a9   : > { %v1832_v1 = vor.u32 1.1754944e-38, %v1831_v16  ;;  %vm1830_vm8 = vcmp.eq.f32.partialorder %v1829_v6, 8.507059e+37 }
 0x9ac   : > { %v2251_v50 = vpop.eup %2250 }
 0x9ad   : > { %v2253_v56 = vpop.eup %2252  ;;  %v1789_v11 = vadd.f32 1.0, %v2251_v50 }
 0x9ae   : > { %v1821_v42 = vmul.f32 %v2253_v56, %v1788_v25  ;;  %vm1826_vm1 = vweird.f32 %v2253_v56 }
 0x9af   : > { %2254 = vrcp.f32 %v1789_v11  ;;  %vm1827_vm7 = vmor %vm1825_vm4, %vm1826_vm1  ;;  %v1846_v3 = vand.u32 2147483648, %v1789_v11  ;;  %v1844_v35 = vand.u32 2147483647, %v1789_v11  ;;  %vm1840_vm10 = vweird.f32 %v1789_v11 }
 0x9b0   : > { %v1822_v17 = vsub.f32 1.0, %v1821_v42 }
 0x9b1   : > { %v1847_v14 = vor.u32 1.1754944e-38, %v1846_v3  ;;  %vm1845_vm12 = vcmp.eq.f32.partialorder %v1844_v35, 8.507059e+37 }
 0x9b2   : > { %v1823_v27 = vmul.f32 %v2253_v56, %v1822_v17 }
 0x9b4   : > { %v1824_v60 = vadd.f32 %v2253_v56, %v1823_v27 }
 0x9b5   : > { %v2255_v62 = vpop.eup %2254 }
 0x9b6   : > { %v1828_v63 = vsel %vm1827_vm7, %v2253_v56, %v1824_v60  ;;  %v1836_v46 = vmul.f32 %v2255_v62, %v1789_v11  ;;  %vm1841_vm9 = vweird.f32 %v2255_v62 }
 0x9b7   : > { %v1833_v0 = vsel %vm1830_vm8, %v1832_v1, %v1828_v63  ;;  %vm1842_vm11 = vmor %vm1840_vm10, %vm1841_vm9 }
 0x9b8   : > { %1852 = vst [vmem:[%s3079_s5 + $0x10] sm:$0xff] %v1833_v0  ;;  %v1837_v53 = vsub.f32 1.0, %v1836_v46 }
 0x9ba   : > { %v1838_v9 = vmul.f32 %v2255_v62, %v1837_v53 }
 0x9bc   : > { %v1839_v13 = vadd.f32 %v2255_v62, %v1838_v9 }
 0x9be   : > { %v1843_v18 = vsel %vm1842_vm11, %v2255_v62, %v1839_v13 }
 0x9bf   : > { %v1848_v51 = vsel %vm1845_vm12, %v1847_v14, %v1843_v18 }
 0x9c0   : > { %1853 = vst [vmem:[%s3079_s5 + $0x18] sm:$0xff] %v1848_v51 }
 0x9c1 PF: > { %p15_p1 = scmp.ge.s32.totalorder %s2435_s28, 4   ;;  %s3117_s15 = smov %s2346_s16 }
 0x9c2   : > { %s3118_s16 = smov %s2350_s17  ;;  %s3119_s17 = smov %s2445_s7 }
 0x9c3   : > { %s3120_s18 = smov %s2435_s28  ;;  %17 = sbr.rel (!%p15_p1) target bundleno = 4 (0x4), region = 88 }
 0x9c8   :  { %1878 = vsyncpa [#allocation3], 1 }
 0x9c9   :  { %1880 = vsyncpa [#allocation3 + $0x1], 1 }
 0x9ca   :  { %1881 = vsyncpa [#allocation5], 1 }

</bundles_post_ra>
